<compile_context>
chip_gen: v7x
topology: tpu7x:2x2x1
jax: 0.10.0
libtpu: 0.0.40
codegen_flags: <defaults>
</compile_context>

<pallas_src>
import functools

import jax
import jax.numpy as jnp
from jax.experimental import pallas as pl
from jax.experimental.pallas import tpu as pltpu

# ------------------------- small synthetic config -------------------------
VOCAB = 64
TYPE_VOCAB = 2
MAX_POS = 16
HIDDEN = 32
N_HEADS = 2
HEAD_DIM = HIDDEN // N_HEADS
INTERMEDIATE = 64
N_LAYERS = 2
NUM_LABELS = 3
LN_EPS = 1e-12
BN_EPS = 1e-5
LANE = 128
NEG_BIG = -1e9

# ----------------------- packed slab layouts (static) ----------------------
# w32 slab: every weight whose input (row) dim == HIDDEN, concatenated along
# lanes: per layer [wqkv | wo | w_ff1], then pooler_w, then head w1.
L32_STRIDE = 3 * HIDDEN + HIDDEN + INTERMEDIATE       # 192 lanes per layer
OFF_QKV = 0
OFF_WO = 3 * HIDDEN
OFF_FF1 = 3 * HIDDEN + HIDDEN
OFF_POOLW = N_LAYERS * L32_STRIDE
OFF_W1 = OFF_POOLW + HIDDEN
W32_LANES = OFF_W1 + 256                              # 672

# w64 slab: weights whose input (row) dim == 64: per-layer w_ff2, head w3.
OFF_W3 = N_LAYERS * HIDDEN
W64_LANES = OFF_W3 + 16                               # 80

# vec slab: every bias / LayerNorm vector, one per row, lane-padded to 256.
VEC_LANES = 256
R_EMB_G, R_EMB_B = 0, 1
R_LAYER0 = 2
ROWS_PER_LAYER = 8
RL_BQKV, RL_BO, RL_LN1G, RL_LN1B, RL_BFF1, RL_BFF2, RL_LN2G, RL_LN2B = range(8)
R_POOLB = R_LAYER0 + N_LAYERS * ROWS_PER_LAYER        # 18
R_B1 = R_POOLB + 1
R_B2 = R_POOLB + 2
R_B3 = R_POOLB + 3
R_BC = R_POOLB + 4
VEC_ROWS = ((R_BC + 1 + 7) // 8) * 8                  # 24


# ------------------------------ fused kernel ------------------------------
def fused_forward_kernel(x_ref, bias_ref, w32_ref, w64_ref, w2_ref, wc_ref,
                         vec_ref, out_ref, ctx_ref, *, batch, seq):
    # Load the packed slabs once; all further slices are static (free).
    vecs = vec_ref[...]            # (VEC_ROWS, 256)
    w32 = w32_ref[...]             # (HIDDEN, W32_LANES)
    w64 = w64_ref[...]             # (64, W64_LANES)

    def vrow(r, n):
        return vecs[r:r + 1, 0:n]  # (1, n) broadcasts over rows

    def layernorm(x, g, b):
        mean = jnp.mean(x, axis=-1, keepdims=True)
        var = jnp.mean((x - mean) ** 2, axis=-1, keepdims=True)
        # rsqrt lands on the EUP slot
        return (x - mean) * jax.lax.rsqrt(var + LN_EPS) * g + b

    # ---- embeddings LayerNorm ----
    h = layernorm(x_ref[...], vrow(R_EMB_G, HIDDEN), vrow(R_EMB_B, HIDDEN))

    bias_bd = bias_ref[...]        # (B*S, B*S) block-diagonal additive key bias

    # ---- encoder layers (everything resident in VMEM / vregs) ----
    for l in range(N_LAYERS):
        wbase = l * L32_STRIDE
        rbase = R_LAYER0 + l * ROWS_PER_LAYER
        wqkv = w32[:, wbase + OFF_QKV: wbase + OFF_QKV + 3 * HIDDEN]
        wo = w32[:, wbase + OFF_WO: wbase + OFF_WO + HIDDEN]
        wff1 = w32[:, wbase + OFF_FF1: wbase + OFF_FF1 + INTERMEDIATE]
        wff2 = w64[:, l * HIDDEN:(l + 1) * HIDDEN]

        # fused QKV projection (attention scale pre-folded into the Q columns)
        qkv = (jnp.dot(h, wqkv, preferred_element_type=jnp.float32)
               + vrow(rbase + RL_BQKV, 3 * HIDDEN))

        # batched-over-batch attention: one score dot and one context dot per
        # head over the flattened (B*S) axis; the block-diagonal bias keeps
        # each batch attending only within its own SxS block.  Each head's
        # context goes directly into its lane range of the scratch buffer.
        for hd in range(N_HEADS):
            c = hd * HEAD_DIM
            q = qkv[:, c:c + HEAD_DIM]
            k = qkv[:, HIDDEN + c:HIDDEN + c + HEAD_DIM]
            v = qkv[:, 2 * HIDDEN + c:2 * HIDDEN + c + HEAD_DIM]
            s = jax.lax.dot_general(q, k, (((1,), (1,)), ((), ())),
                                    preferred_element_type=jnp.float32)
            s = s + bias_bd
            m = jnp.max(s, axis=-1, keepdims=True)
            p = jnp.exp(s - m)
            p = p * pl.reciprocal(jnp.sum(p, axis=-1, keepdims=True),
                                  approx=True)
            ctx_ref[:, c:c + HEAD_DIM] = jnp.dot(
                p, v, preferred_element_type=jnp.float32)

        attn_out = (jnp.dot(ctx_ref[...], wo, preferred_element_type=jnp.float32)
                    + vrow(rbase + RL_BO, HIDDEN))
        h = layernorm(h + attn_out,
                      vrow(rbase + RL_LN1G, HIDDEN), vrow(rbase + RL_LN1B, HIDDEN))

        f = (jnp.dot(h, wff1, preferred_element_type=jnp.float32)
             + vrow(rbase + RL_BFF1, INTERMEDIATE))
        # TODO(synk): HF BERT uses exact (erf-based) GELU; tanh approximation
        # used here for guaranteed Mosaic lowering (tiny numerical difference).
        f = 0.5 * f * (1.0 + jnp.tanh(0.7978845608028654
                                      * (f + 0.044715 * f * f * f)))
        f = (jnp.dot(f, wff2, preferred_element_type=jnp.float32)
             + vrow(rbase + RL_BFF2, HIDDEN))
        h = layernorm(h + f,
                      vrow(rbase + RL_LN2G, HIDDEN), vrow(rbase + RL_LN2B, HIDDEN))

    # ---- pooler on the [CLS] token (reshape-based row select, no concat) ----
    cls = h.reshape(batch, seq, HIDDEN)[:, 0, :]                  # (B, HIDDEN)
    pooler_w = w32[:, OFF_POOLW:OFF_POOLW + HIDDEN]
    pooled = jnp.tanh(
        jnp.dot(cls, pooler_w, preferred_element_type=jnp.float32)
        + vrow(R_POOLB, HIDDEN))

    # ---- classification head: Linear(+folded BN) + ReLU x3 (dropout = id) ----
    w1 = w32[:, OFF_W1:OFF_W1 + 256]
    t = jnp.dot(pooled, w1, preferred_element_type=jnp.float32) + vrow(R_B1, 256)
    t = jnp.maximum(t, 0.0)
    t = jnp.dot(t, w2_ref[...], preferred_element_type=jnp.float32) + vrow(R_B2, 64)
    t = jnp.maximum(t, 0.0)
    w3 = w64[:, OFF_W3:OFF_W3 + 16]
    t = jnp.dot(t, w3, preferred_element_type=jnp.float32) + vrow(R_B3, 16)
    t = jnp.maximum(t, 0.0)

    # classifier padded to a lane-dense 128-wide slab (padded bias lanes -1e9)
    logits_pad = (jnp.dot(t, wc_ref[...], preferred_element_type=jnp.float32)
                  + vrow(R_BC, LANE))
    m = jnp.max(logits_pad, axis=-1, keepdims=True)
    z = logits_pad - m
    lse = jnp.log(jnp.sum(jnp.exp(z), axis=-1, keepdims=True))

    # single lane-dense output slab: [:, :128]=log_probs(pad), [:, 128:]=logits(pad)
    out_ref[:, 0:LANE] = (z - lse).astype(out_ref.dtype)
    out_ref[:, LANE:2 * LANE] = logits_pad.astype(out_ref.dtype)


# ------------------------------ parameters ------------------------------
def init_params(key):
    keys = iter(jax.random.split(key, 128))

    def w(shape, scale=0.02):
        return jax.random.normal(next(keys), shape, jnp.float32) * scale

    zeros = lambda s: jnp.zeros(s, jnp.float32)
    ones = lambda s: jnp.ones(s, jnp.float32)

    p = {
        "word_emb": w((VOCAB, HIDDEN)),
        "pos_emb": w((MAX_POS, HIDDEN)),
        "type_emb": w((TYPE_VOCAB, HIDDEN)),
    }

    attn_scale = 1.0 / (HEAD_DIM ** 0.5)

    w32 = jnp.zeros((HIDDEN, W32_LANES), jnp.float32)
    w64 = jnp.zeros((INTERMEDIATE, W64_LANES), jnp.float32)
    vec = jnp.zeros((VEC_ROWS, VEC_LANES), jnp.float32)

    def put_vec(slab, row, v):
        v = v.reshape(-1)
        return slab.at[row, :v.shape[0]].set(v)

    vec = put_vec(vec, R_EMB_G, ones((HIDDEN,)))
    vec = put_vec(vec, R_EMB_B, zeros((HIDDEN,)))

    for l in range(N_LAYERS):
        wbase = l * L32_STRIDE
        rbase = R_LAYER0 + l * ROWS_PER_LAYER
        # fused QKV; 1/sqrt(head_dim) folded into the Q columns (and Q bias)
        wq = w((HIDDEN, HIDDEN)) * attn_scale
        wk = w((HIDDEN, HIDDEN))
        wv = w((HIDDEN, HIDDEN))
        bq = zeros((HIDDEN,)) * attn_scale
        bk = zeros((HIDDEN,))
        bv = zeros((HIDDEN,))
        wqkv = jnp.concatenate([wq, wk, wv], axis=1)
        bqkv = jnp.concatenate([bq, bk, bv], axis=0)

        w32 = w32.at[:, wbase + OFF_QKV: wbase + OFF_QKV + 3 * HIDDEN].set(wqkv)
        w32 = w32.at[:, wbase + OFF_WO: wbase + OFF_WO + HIDDEN].set(w((HIDDEN, HIDDEN)))
        w32 = w32.at[:, wbase + OFF_FF1: wbase + OFF_FF1 + INTERMEDIATE].set(
            w((HIDDEN, INTERMEDIATE)))
        w64 = w64.at[:, l * HIDDEN:(l + 1) * HIDDEN].set(w((INTERMEDIATE, HIDDEN)))

        vec = put_vec(vec, rbase + RL_BQKV, bqkv)
        vec = put_vec(vec, rbase + RL_BO, zeros((HIDDEN,)))
        vec = put_vec(vec, rbase + RL_LN1G, ones((HIDDEN,)))
        vec = put_vec(vec, rbase + RL_LN1B, zeros((HIDDEN,)))
        vec = put_vec(vec, rbase + RL_BFF1, zeros((INTERMEDIATE,)))
        vec = put_vec(vec, rbase + RL_BFF2, zeros((HIDDEN,)))
        vec = put_vec(vec, rbase + RL_LN2G, ones((HIDDEN,)))
        vec = put_vec(vec, rbase + RL_LN2B, zeros((HIDDEN,)))

    # pooler
    w32 = w32.at[:, OFF_POOLW:OFF_POOLW + HIDDEN].set(w((HIDDEN, HIDDEN)))
    vec = put_vec(vec, R_POOLB, zeros((HIDDEN,)))

    # head Linear layers with eval-mode BatchNorm1d folded in:
    #   W' = W * gamma/sqrt(var+eps)  (per output column), b' = b*s + (beta - mean*s)
    def fold_bn(W, b, dim):
        gamma, beta = ones((dim,)), zeros((dim,))
        r_mean, r_var = zeros((dim,)), ones((dim,))
        s = gamma / jnp.sqrt(r_var + BN_EPS)
        t = beta - r_mean * s
        return W * s[None, :], b * s + t

    w1, b1 = fold_bn(w((HIDDEN, 256)), w((256,)), 256)
    w2, b2 = fold_bn(w((256, 64)), w((64,)), 64)
    w3, b3 = fold_bn(w((64, 16)), w((16,)), 16)
    w32 = w32.at[:, OFF_W1:OFF_W1 + 256].set(w1)
    w64 = w64.at[:, OFF_W3:OFF_W3 + 16].set(w3)
    vec = put_vec(vec, R_B1, b1)
    vec = put_vec(vec, R_B2, b2)
    vec = put_vec(vec, R_B3, b3)

    # classifier padded to a lane-dense 128-wide slab; padded bias lanes = -1e9
    # so they vanish under the (f32) softmax and get sliced away in the wrapper.
    wc = jnp.pad(w((16, NUM_LABELS)), ((0, 0), (0, LANE - NUM_LABELS)))
    bc = jnp.concatenate([w((NUM_LABELS,)),
                          jnp.full((LANE - NUM_LABELS,), NEG_BIG, jnp.float32)])
    vec = put_vec(vec, R_BC, bc)

    p["w32"] = w32
    p["w64"] = w64
    p["w2"] = w2
    p["wc"] = wc
    p["vec"] = vec
    return p


# -------------------------------- forward --------------------------------
def model_forward(params, input_ids, segment_ids, input_mask):
    B, S = input_ids.shape
    pos_ids = jnp.arange(S)

    # embeddings (data-dependent gather is plain-JAX glue)
    emb = (jnp.take(params["word_emb"], input_ids, axis=0)
           + jnp.take(params["pos_emb"], pos_ids, axis=0)[None, :, :]
           + jnp.take(params["type_emb"], segment_ids, axis=0))
    x = emb.reshape(B * S, HIDDEN).astype(jnp.float32)

    # Block-diagonal additive attention bias over the flattened (B*S) key axis:
    # same-batch keys get the HF-style -10000*(1-mask); cross-batch keys -1e9
    # (exp underflows to exactly 0 in f32).  Tiny at these shapes; at real BERT
    # shapes tile attention over S instead of materializing this.
    key_bias = ((1.0 - input_mask.astype(jnp.float32)) * -10000.0).reshape(B * S)
    row_batch = jnp.arange(B * S) // S
    same = row_batch[:, None] == row_batch[None, :]
    bias_bd = jnp.where(same, key_bias[None, :], NEG_BIG)        # (B*S, B*S)

    args = [x, bias_bd, params["w32"], params["w64"], params["w2"],
            params["wc"], params["vec"]]

    def spec(shape):
        nd = len(shape)
        return pl.BlockSpec(shape, lambda i, _nd=nd: (0,) * _nd)

    kernel = functools.partial(fused_forward_kernel, batch=B, seq=S)
    out = pl.pallas_call(
        kernel,
        grid=(1,),
        in_specs=[spec(a.shape) for a in args],
        out_specs=spec((B, 2 * LANE)),
        out_shape=jax.ShapeDtypeStruct((B, 2 * LANE), jnp.float32),
        scratch_shapes=[pltpu.VMEM((B * S, HIDDEN), jnp.float32)],
        # single grid step today; grid the batch axis as "parallel" to use the
        # second TensorCore on v7x once per-step work exceeds ~0.35us overhead.
        compiler_params=pltpu.CompilerParams(dimension_semantics=("arbitrary",)),
    )(*args)

    log_probs = out[:, :NUM_LABELS]
    logits = out[:, LANE:LANE + NUM_LABELS]
    # NUM_LABELS > 1 -> (log_softmax(logits), logits); (tanh branch unused)
    return log_probs, logits


# ---------------------------------- main ----------------------------------
if __name__ == "__main__":
    key = jax.random.PRNGKey(0)
    k_param, k_ids = jax.random.split(key)

    params = init_params(k_param)

    B, S = 2, 8
    input_ids = jax.random.randint(k_ids, (B, S), 0, VOCAB, dtype=jnp.int32)
    segment_ids = jnp.zeros((B, S), jnp.int32)
    input_mask = jnp.ones((B, S), jnp.int32)

    forward = jax.jit(model_forward)
    log_probs, logits = forward(params, input_ids, segment_ids, input_mask)
    jax.block_until_ready((log_probs, logits))

    assert log_probs.shape == (B, NUM_LABELS) and logits.shape == (B, NUM_LABELS)
    # log_softmax rows must (numerically) sum to 1 after exp
    assert bool(jnp.all(jnp.abs(jnp.sum(jnp.exp(log_probs), axis=1) - 1.0) < 1e-4))
    print("KERNEL_OK")
</pallas_src>

<mosaic_0001>
module attributes {stable_mosaic.version = 11 : i64} {
  func.func @fused_forward_kernel(%arg0: i32, %arg1: memref<16x32xf32, #tpu.memory_space<vmem>>, %arg2: memref<16x16xf32, #tpu.memory_space<vmem>>, %arg3: memref<32x672xf32, #tpu.memory_space<vmem>>, %arg4: memref<64x80xf32, #tpu.memory_space<vmem>>, %arg5: memref<256x64xf32, #tpu.memory_space<vmem>>, %arg6: memref<16x128xf32, #tpu.memory_space<vmem>>, %arg7: memref<24x256xf32, #tpu.memory_space<vmem>>, %arg8: memref<2x256xf32, #tpu.memory_space<vmem>>, %arg9: memref<16x32xf32, #tpu.memory_space<vmem>>) attributes {dimension_semantics = [#tpu.dimension_semantics<arbitrary>], iteration_bounds = array<i64: 1>, scalar_prefetch = 0 : i64, scratch_operands = 1 : i64, tpu.core_type = #tpu.core_type<tc>, window_params = [{pipeline_mode = #tpu.pipeline_mode<synchronous>, transform_indices = @transform_0, window_bounds = array<i64: 16, 32>}, {pipeline_mode = #tpu.pipeline_mode<synchronous>, transform_indices = @transform_1, window_bounds = array<i64: 16, 16>}, {pipeline_mode = #tpu.pipeline_mode<synchronous>, transform_indices = @transform_2, window_bounds = array<i64: 32, 672>}, {pipeline_mode = #tpu.pipeline_mode<synchronous>, transform_indices = @transform_3, window_bounds = array<i64: 64, 80>}, {pipeline_mode = #tpu.pipeline_mode<synchronous>, transform_indices = @transform_4, window_bounds = array<i64: 256, 64>}, {pipeline_mode = #tpu.pipeline_mode<synchronous>, transform_indices = @transform_5, window_bounds = array<i64: 16, 128>}, {pipeline_mode = #tpu.pipeline_mode<synchronous>, transform_indices = @transform_6, window_bounds = array<i64: 24, 256>}, {pipeline_mode = #tpu.pipeline_mode<synchronous>, transform_indices = @transform_7, window_bounds = array<i64: 2, 256>}]} {
    %c0 = arith.constant 0 : index
    %c0_0 = arith.constant 0 : index
    %0 = vector.load %arg7[%c0, %c0_0] : memref<24x256xf32, #tpu.memory_space<vmem>>, vector<24x256xf32>
    %c0_1 = arith.constant 0 : index
    %c0_2 = arith.constant 0 : index
    %1 = vector.load %arg3[%c0_1, %c0_2] : memref<32x672xf32, #tpu.memory_space<vmem>>, vector<32x672xf32>
    %c0_3 = arith.constant 0 : index
    %c0_4 = arith.constant 0 : index
    %2 = vector.load %arg4[%c0_3, %c0_4] : memref<64x80xf32, #tpu.memory_space<vmem>>, vector<64x80xf32>
    %c0_5 = arith.constant 0 : index
    %c0_6 = arith.constant 0 : index
    %3 = vector.load %arg1[%c0_5, %c0_6] : memref<16x32xf32, #tpu.memory_space<vmem>>, vector<16x32xf32>
    %4 = vector.extract_strided_slice %0 {offsets = [0, 0], sizes = [1, 32], strides = [1, 1]} : vector<24x256xf32> to vector<1x32xf32>
    %5 = vector.extract_strided_slice %0 {offsets = [1, 0], sizes = [1, 32], strides = [1, 1]} : vector<24x256xf32> to vector<1x32xf32>
    %cst = arith.constant dense<0.000000e+00> : vector<16xf32>
    %6 = vector.multi_reduction <add>, %3, %cst [1] : vector<16x32xf32> to vector<16xf32>
    %7 = vector.shape_cast %6 : vector<16xf32> to vector<16x1xf32>
    %cst_7 = arith.constant 3.200000e+01 : f32
    %8 = vector.broadcast %cst_7 : f32 to vector<16x1xf32>
    %9 = arith.divf %7, %8 : vector<16x1xf32>
    %10 = vector.broadcast %9 : vector<16x1xf32> to vector<16x32xf32>
    %11 = arith.subf %3, %10 : vector<16x32xf32>
    %12 = arith.mulf %11, %11 : vector<16x32xf32>
    %cst_8 = arith.constant dense<0.000000e+00> : vector<16xf32>
    %13 = vector.multi_reduction <add>, %12, %cst_8 [1] : vector<16x32xf32> to vector<16xf32>
    %14 = vector.shape_cast %13 : vector<16xf32> to vector<16x1xf32>
    %cst_9 = arith.constant 3.200000e+01 : f32
    %15 = vector.broadcast %cst_9 : f32 to vector<16x1xf32>
    %16 = arith.divf %14, %15 : vector<16x1xf32>
    %17 = vector.broadcast %9 : vector<16x1xf32> to vector<16x32xf32>
    %18 = arith.subf %3, %17 : vector<16x32xf32>
    %cst_10 = arith.constant 9.99999996E-13 : f32
    %19 = vector.broadcast %cst_10 : f32 to vector<16x1xf32>
    %20 = arith.addf %16, %19 : vector<16x1xf32>
    %21 = math.rsqrt %20 : vector<16x1xf32>
    %22 = vector.broadcast %21 : vector<16x1xf32> to vector<16x32xf32>
    %23 = arith.mulf %18, %22 : vector<16x32xf32>
    %24 = vector.broadcast %4 : vector<1x32xf32> to vector<16x32xf32>
    %25 = arith.mulf %23, %24 : vector<16x32xf32>
    %26 = vector.broadcast %5 : vector<1x32xf32> to vector<16x32xf32>
    %27 = arith.addf %25, %26 : vector<16x32xf32>
    %c0_11 = arith.constant 0 : index
    %c0_12 = arith.constant 0 : index
    %28 = vector.load %arg2[%c0_11, %c0_12] : memref<16x16xf32, #tpu.memory_space<vmem>>, vector<16x16xf32>
    %29 = vector.extract_strided_slice %1 {offsets = [0, 0], sizes = [32, 96], strides = [1, 1]} : vector<32x672xf32> to vector<32x96xf32>
    %30 = vector.extract_strided_slice %1 {offsets = [0, 96], sizes = [32, 32], strides = [1, 1]} : vector<32x672xf32> to vector<32x32xf32>
    %31 = vector.extract_strided_slice %1 {offsets = [0, 128], sizes = [32, 64], strides = [1, 1]} : vector<32x672xf32> to vector<32x64xf32>
    %32 = vector.extract_strided_slice %2 {offsets = [0, 0], sizes = [64, 32], strides = [1, 1]} : vector<64x80xf32> to vector<64x32xf32>
    %cst_13 = arith.constant dense<0.000000e+00> : vector<16x96xf32>
    %33 = tpu.matmul %27, %29, %cst_13 {dimension_numbers = #tpu.dot_dimension_numbers<[1], [0], [0], [1], [0, 0, 1, 1], [], []>} : vector<16x32xf32>, vector<32x96xf32>, vector<16x96xf32> -> vector<16x96xf32>
    %34 = vector.extract_strided_slice %0 {offsets = [2, 0], sizes = [1, 96], strides = [1, 1]} : vector<24x256xf32> to vector<1x96xf32>
    %35 = vector.broadcast %34 : vector<1x96xf32> to vector<16x96xf32>
    %36 = arith.addf %33, %35 : vector<16x96xf32>
    %37 = vector.extract_strided_slice %36 {offsets = [0, 0], sizes = [16, 16], strides = [1, 1]} : vector<16x96xf32> to vector<16x16xf32>
    %38 = vector.extract_strided_slice %36 {offsets = [0, 32], sizes = [16, 16], strides = [1, 1]} : vector<16x96xf32> to vector<16x16xf32>
    %39 = vector.extract_strided_slice %36 {offsets = [0, 64], sizes = [16, 16], strides = [1, 1]} : vector<16x96xf32> to vector<16x16xf32>
    %cst_14 = arith.constant dense<0.000000e+00> : vector<16x16xf32>
    %40 = tpu.matmul %37, %38, %cst_14 {dimension_numbers = #tpu.dot_dimension_numbers<[1], [1], [0], [0], [0, 0, 1, 0], [], []>} : vector<16x16xf32>, vector<16x16xf32>, vector<16x16xf32> -> vector<16x16xf32>
    %41 = arith.addf %40, %28 : vector<16x16xf32>
    %cst_15 = arith.constant dense<0xFF800000> : vector<16xf32>
    %42 = vector.multi_reduction <maximumf>, %41, %cst_15 [1] : vector<16x16xf32> to vector<16xf32>
    %43 = vector.shape_cast %42 : vector<16xf32> to vector<16x1xf32>
    %44 = vector.broadcast %43 : vector<16x1xf32> to vector<16x16xf32>
    %45 = arith.subf %41, %44 : vector<16x16xf32>
    %46 = math.exp %45 : vector<16x16xf32>
    %cst_16 = arith.constant dense<0.000000e+00> : vector<16xf32>
    %47 = vector.multi_reduction <add>, %46, %cst_16 [1] : vector<16x16xf32> to vector<16xf32>
    %48 = vector.shape_cast %47 : vector<16xf32> to vector<16x1xf32>
    %49 = tpu.reciprocal %48 {approx = true} : vector<16x1xf32> -> vector<16x1xf32>
    %50 = vector.broadcast %49 : vector<16x1xf32> to vector<16x16xf32>
    %51 = arith.mulf %46, %50 : vector<16x16xf32>
    %cst_17 = arith.constant dense<0.000000e+00> : vector<16x16xf32>
    %52 = tpu.matmul %51, %39, %cst_17 {dimension_numbers = #tpu.dot_dimension_numbers<[1], [0], [0], [1], [0, 0, 1, 1], [], []>} : vector<16x16xf32>, vector<16x16xf32>, vector<16x16xf32> -> vector<16x16xf32>
    %c0_18 = arith.constant 0 : index
    %c0_19 = arith.constant 0 : index
    %53 = vector.load %arg9[%c0_18, %c0_19] : memref<16x32xf32, #tpu.memory_space<vmem>>, vector<16x16xf32>
    tpu.vector_store %arg9[%c0_18, %c0_19], %52 {strides = array<i32>} : memref<16x32xf32, #tpu.memory_space<vmem>>, vector<16x16xf32>,
    %54 = vector.extract_strided_slice %36 {offsets = [0, 16], sizes = [16, 16], strides = [1, 1]} : vector<16x96xf32> to vector<16x16xf32>
    %55 = vector.extract_strided_slice %36 {offsets = [0, 48], sizes = [16, 16], strides = [1, 1]} : vector<16x96xf32> to vector<16x16xf32>
    %56 = vector.extract_strided_slice %36 {offsets = [0, 80], sizes = [16, 16], strides = [1, 1]} : vector<16x96xf32> to vector<16x16xf32>
    %cst_20 = arith.constant dense<0.000000e+00> : vector<16x16xf32>
    %57 = tpu.matmul %54, %55, %cst_20 {dimension_numbers = #tpu.dot_dimension_numbers<[1], [1], [0], [0], [0, 0, 1, 0], [], []>} : vector<16x16xf32>, vector<16x16xf32>, vector<16x16xf32> -> vector<16x16xf32>
    %58 = arith.addf %57, %28 : vector<16x16xf32>
    %cst_21 = arith.constant dense<0xFF800000> : vector<16xf32>
    %59 = vector.multi_reduction <maximumf>, %58, %cst_21 [1] : vector<16x16xf32> to vector<16xf32>
    %60 = vector.shape_cast %59 : vector<16xf32> to vector<16x1xf32>
    %61 = vector.broadcast %60 : vector<16x1xf32> to vector<16x16xf32>
    %62 = arith.subf %58, %61 : vector<16x16xf32>
    %63 = math.exp %62 : vector<16x16xf32>
    %cst_22 = arith.constant dense<0.000000e+00> : vector<16xf32>
    %64 = vector.multi_reduction <add>, %63, %cst_22 [1] : vector<16x16xf32> to vector<16xf32>
    %65 = vector.shape_cast %64 : vector<16xf32> to vector<16x1xf32>
    %66 = tpu.reciprocal %65 {approx = true} : vector<16x1xf32> -> vector<16x1xf32>
    %67 = vector.broadcast %66 : vector<16x1xf32> to vector<16x16xf32>
    %68 = arith.mulf %63, %67 : vector<16x16xf32>
    %cst_23 = arith.constant dense<0.000000e+00> : vector<16x16xf32>
    %69 = tpu.matmul %68, %56, %cst_23 {dimension_numbers = #tpu.dot_dimension_numbers<[1], [0], [0], [1], [0, 0, 1, 1], [], []>} : vector<16x16xf32>, vector<16x16xf32>, vector<16x16xf32> -> vector<16x16xf32>
    %c0_24 = arith.constant 0 : index
    %c16 = arith.constant 16 : index
    %70 = vector.load %arg9[%c0_24, %c16] : memref<16x32xf32, #tpu.memory_space<vmem>>, vector<16x16xf32>
    tpu.vector_store %arg9[%c0_24, %c16], %69 {strides = array<i32>} : memref<16x32xf32, #tpu.memory_space<vmem>>, vector<16x16xf32>,
    %c0_25 = arith.constant 0 : index
    %c0_26 = arith.constant 0 : index
    %71 = vector.load %arg9[%c0_25, %c0_26] : memref<16x32xf32, #tpu.memory_space<vmem>>, vector<16x32xf32>
    %cst_27 = arith.constant dense<0.000000e+00> : vector<16x32xf32>
    %72 = tpu.matmul %71, %30, %cst_27 {dimension_numbers = #tpu.dot_dimension_numbers<[1], [0], [0], [1], [0, 0, 1, 1], [], []>} : vector<16x32xf32>, vector<32x32xf32>, vector<16x32xf32> -> vector<16x32xf32>
    %73 = vector.extract_strided_slice %0 {offsets = [3, 0], sizes = [1, 32], strides = [1, 1]} : vector<24x256xf32> to vector<1x32xf32>
    %74 = vector.broadcast %73 : vector<1x32xf32> to vector<16x32xf32>
    %75 = arith.addf %72, %74 : vector<16x32xf32>
    %76 = arith.addf %27, %75 : vector<16x32xf32>
    %77 = vector.extract_strided_slice %0 {offsets = [4, 0], sizes = [1, 32], strides = [1, 1]} : vector<24x256xf32> to vector<1x32xf32>
    %78 = vector.extract_strided_slice %0 {offsets = [5, 0], sizes = [1, 32], strides = [1, 1]} : vector<24x256xf32> to vector<1x32xf32>
    %cst_28 = arith.constant dense<0.000000e+00> : vector<16xf32>
    %79 = vector.multi_reduction <add>, %76, %cst_28 [1] : vector<16x32xf32> to vector<16xf32>
    %80 = vector.shape_cast %79 : vector<16xf32> to vector<16x1xf32>
    %cst_29 = arith.constant 3.200000e+01 : f32
    %81 = vector.broadcast %cst_29 : f32 to vector<16x1xf32>
    %82 = arith.divf %80, %81 : vector<16x1xf32>
    %83 = vector.broadcast %82 : vector<16x1xf32> to vector<16x32xf32>
    %84 = arith.subf %76, %83 : vector<16x32xf32>
    %85 = arith.mulf %84, %84 : vector<16x32xf32>
    %cst_30 = arith.constant dense<0.000000e+00> : vector<16xf32>
    %86 = vector.multi_reduction <add>, %85, %cst_30 [1] : vector<16x32xf32> to vector<16xf32>
    %87 = vector.shape_cast %86 : vector<16xf32> to vector<16x1xf32>
    %cst_31 = arith.constant 3.200000e+01 : f32
    %88 = vector.broadcast %cst_31 : f32 to vector<16x1xf32>
    %89 = arith.divf %87, %88 : vector<16x1xf32>
    %90 = vector.broadcast %82 : vector<16x1xf32> to vector<16x32xf32>
    %91 = arith.subf %76, %90 : vector<16x32xf32>
    %cst_32 = arith.constant 9.99999996E-13 : f32
    %92 = vector.broadcast %cst_32 : f32 to vector<16x1xf32>
    %93 = arith.addf %89, %92 : vector<16x1xf32>
    %94 = math.rsqrt %93 : vector<16x1xf32>
    %95 = vector.broadcast %94 : vector<16x1xf32> to vector<16x32xf32>
    %96 = arith.mulf %91, %95 : vector<16x32xf32>
    %97 = vector.broadcast %77 : vector<1x32xf32> to vector<16x32xf32>
    %98 = arith.mulf %96, %97 : vector<16x32xf32>
    %99 = vector.broadcast %78 : vector<1x32xf32> to vector<16x32xf32>
    %100 = arith.addf %98, %99 : vector<16x32xf32>
    %cst_33 = arith.constant dense<0.000000e+00> : vector<16x64xf32>
    %101 = tpu.matmul %100, %31, %cst_33 {dimension_numbers = #tpu.dot_dimension_numbers<[1], [0], [0], [1], [0, 0, 1, 1], [], []>} : vector<16x32xf32>, vector<32x64xf32>, vector<16x64xf32> -> vector<16x64xf32>
    %102 = vector.extract_strided_slice %0 {offsets = [6, 0], sizes = [1, 64], strides = [1, 1]} : vector<24x256xf32> to vector<1x64xf32>
    %103 = vector.broadcast %102 : vector<1x64xf32> to vector<16x64xf32>
    %104 = arith.addf %101, %103 : vector<16x64xf32>
    %cst_34 = arith.constant 5.000000e-01 : f32
    %105 = vector.broadcast %cst_34 : f32 to vector<16x64xf32>
    %106 = arith.mulf %105, %104 : vector<16x64xf32>
    %cst_35 = arith.constant 4.471500e-02 : f32
    %107 = vector.broadcast %cst_35 : f32 to vector<16x64xf32>
    %108 = arith.mulf %107, %104 : vector<16x64xf32>
    %109 = arith.mulf %108, %104 : vector<16x64xf32>
    %110 = arith.mulf %109, %104 : vector<16x64xf32>
    %111 = arith.addf %104, %110 : vector<16x64xf32>
    %cst_36 = arith.constant 0.797884583 : f32
    %112 = vector.broadcast %cst_36 : f32 to vector<16x64xf32>
    %113 = arith.mulf %112, %111 : vector<16x64xf32>
    %114 = math.tanh %113 : vector<16x64xf32>
    %cst_37 = arith.constant 1.000000e+00 : f32
    %115 = vector.broadcast %cst_37 : f32 to vector<16x64xf32>
    %116 = arith.addf %115, %114 : vector<16x64xf32>
    %117 = arith.mulf %106, %116 : vector<16x64xf32>
    %cst_38 = arith.constant dense<0.000000e+00> : vector<16x32xf32>
    %118 = tpu.matmul %117, %32, %cst_38 {dimension_numbers = #tpu.dot_dimension_numbers<[1], [0], [0], [1], [0, 0, 1, 1], [], []>} : vector<16x64xf32>, vector<64x32xf32>, vector<16x32xf32> -> vector<16x32xf32>
    %119 = vector.extract_strided_slice %0 {offsets = [7, 0], sizes = [1, 32], strides = [1, 1]} : vector<24x256xf32> to vector<1x32xf32>
    %120 = vector.broadcast %119 : vector<1x32xf32> to vector<16x32xf32>
    %121 = arith.addf %118, %120 : vector<16x32xf32>
    %122 = arith.addf %100, %121 : vector<16x32xf32>
    %123 = vector.extract_strided_slice %0 {offsets = [8, 0], sizes = [1, 32], strides = [1, 1]} : vector<24x256xf32> to vector<1x32xf32>
    %124 = vector.extract_strided_slice %0 {offsets = [9, 0], sizes = [1, 32], strides = [1, 1]} : vector<24x256xf32> to vector<1x32xf32>
    %cst_39 = arith.constant dense<0.000000e+00> : vector<16xf32>
    %125 = vector.multi_reduction <add>, %122, %cst_39 [1] : vector<16x32xf32> to vector<16xf32>
    %126 = vector.shape_cast %125 : vector<16xf32> to vector<16x1xf32>
    %cst_40 = arith.constant 3.200000e+01 : f32
    %127 = vector.broadcast %cst_40 : f32 to vector<16x1xf32>
    %128 = arith.divf %126, %127 : vector<16x1xf32>
    %129 = vector.broadcast %128 : vector<16x1xf32> to vector<16x32xf32>
    %130 = arith.subf %122, %129 : vector<16x32xf32>
    %131 = arith.mulf %130, %130 : vector<16x32xf32>
    %cst_41 = arith.constant dense<0.000000e+00> : vector<16xf32>
    %132 = vector.multi_reduction <add>, %131, %cst_41 [1] : vector<16x32xf32> to vector<16xf32>
    %133 = vector.shape_cast %132 : vector<16xf32> to vector<16x1xf32>
    %cst_42 = arith.constant 3.200000e+01 : f32
    %134 = vector.broadcast %cst_42 : f32 to vector<16x1xf32>
    %135 = arith.divf %133, %134 : vector<16x1xf32>
    %136 = vector.broadcast %128 : vector<16x1xf32> to vector<16x32xf32>
    %137 = arith.subf %122, %136 : vector<16x32xf32>
    %cst_43 = arith.constant 9.99999996E-13 : f32
    %138 = vector.broadcast %cst_43 : f32 to vector<16x1xf32>
    %139 = arith.addf %135, %138 : vector<16x1xf32>
    %140 = math.rsqrt %139 : vector<16x1xf32>
    %141 = vector.broadcast %140 : vector<16x1xf32> to vector<16x32xf32>
    %142 = arith.mulf %137, %141 : vector<16x32xf32>
    %143 = vector.broadcast %123 : vector<1x32xf32> to vector<16x32xf32>
    %144 = arith.mulf %142, %143 : vector<16x32xf32>
    %145 = vector.broadcast %124 : vector<1x32xf32> to vector<16x32xf32>
    %146 = arith.addf %144, %145 : vector<16x32xf32>
    %147 = vector.extract_strided_slice %1 {offsets = [0, 192], sizes = [32, 96], strides = [1, 1]} : vector<32x672xf32> to vector<32x96xf32>
    %148 = vector.extract_strided_slice %1 {offsets = [0, 288], sizes = [32, 32], strides = [1, 1]} : vector<32x672xf32> to vector<32x32xf32>
    %149 = vector.extract_strided_slice %1 {offsets = [0, 320], sizes = [32, 64], strides = [1, 1]} : vector<32x672xf32> to vector<32x64xf32>
    %150 = vector.extract_strided_slice %2 {offsets = [0, 32], sizes = [64, 32], strides = [1, 1]} : vector<64x80xf32> to vector<64x32xf32>
    %cst_44 = arith.constant dense<0.000000e+00> : vector<16x96xf32>
    %151 = tpu.matmul %146, %147, %cst_44 {dimension_numbers = #tpu.dot_dimension_numbers<[1], [0], [0], [1], [0, 0, 1, 1], [], []>} : vector<16x32xf32>, vector<32x96xf32>, vector<16x96xf32> -> vector<16x96xf32>
    %152 = vector.extract_strided_slice %0 {offsets = [10, 0], sizes = [1, 96], strides = [1, 1]} : vector<24x256xf32> to vector<1x96xf32>
    %153 = vector.broadcast %152 : vector<1x96xf32> to vector<16x96xf32>
    %154 = arith.addf %151, %153 : vector<16x96xf32>
    %155 = vector.extract_strided_slice %154 {offsets = [0, 0], sizes = [16, 16], strides = [1, 1]} : vector<16x96xf32> to vector<16x16xf32>
    %156 = vector.extract_strided_slice %154 {offsets = [0, 32], sizes = [16, 16], strides = [1, 1]} : vector<16x96xf32> to vector<16x16xf32>
    %157 = vector.extract_strided_slice %154 {offsets = [0, 64], sizes = [16, 16], strides = [1, 1]} : vector<16x96xf32> to vector<16x16xf32>
    %cst_45 = arith.constant dense<0.000000e+00> : vector<16x16xf32>
    %158 = tpu.matmul %155, %156, %cst_45 {dimension_numbers = #tpu.dot_dimension_numbers<[1], [1], [0], [0], [0, 0, 1, 0], [], []>} : vector<16x16xf32>, vector<16x16xf32>, vector<16x16xf32> -> vector<16x16xf32>
    %159 = arith.addf %158, %28 : vector<16x16xf32>
    %cst_46 = arith.constant dense<0xFF800000> : vector<16xf32>
    %160 = vector.multi_reduction <maximumf>, %159, %cst_46 [1] : vector<16x16xf32> to vector<16xf32>
    %161 = vector.shape_cast %160 : vector<16xf32> to vector<16x1xf32>
    %162 = vector.broadcast %161 : vector<16x1xf32> to vector<16x16xf32>
    %163 = arith.subf %159, %162 : vector<16x16xf32>
    %164 = math.exp %163 : vector<16x16xf32>
    %cst_47 = arith.constant dense<0.000000e+00> : vector<16xf32>
    %165 = vector.multi_reduction <add>, %164, %cst_47 [1] : vector<16x16xf32> to vector<16xf32>
    %166 = vector.shape_cast %165 : vector<16xf32> to vector<16x1xf32>
    %167 = tpu.reciprocal %166 {approx = true} : vector<16x1xf32> -> vector<16x1xf32>
    %168 = vector.broadcast %167 : vector<16x1xf32> to vector<16x16xf32>
    %169 = arith.mulf %164, %168 : vector<16x16xf32>
    %cst_48 = arith.constant dense<0.000000e+00> : vector<16x16xf32>
    %170 = tpu.matmul %169, %157, %cst_48 {dimension_numbers = #tpu.dot_dimension_numbers<[1], [0], [0], [1], [0, 0, 1, 1], [], []>} : vector<16x16xf32>, vector<16x16xf32>, vector<16x16xf32> -> vector<16x16xf32>
    %c0_49 = arith.constant 0 : index
    %c0_50 = arith.constant 0 : index
    %171 = vector.load %arg9[%c0_49, %c0_50] : memref<16x32xf32, #tpu.memory_space<vmem>>, vector<16x16xf32>
    tpu.vector_store %arg9[%c0_49, %c0_50], %170 {strides = array<i32>} : memref<16x32xf32, #tpu.memory_space<vmem>>, vector<16x16xf32>,
    %172 = vector.extract_strided_slice %154 {offsets = [0, 16], sizes = [16, 16], strides = [1, 1]} : vector<16x96xf32> to vector<16x16xf32>
    %173 = vector.extract_strided_slice %154 {offsets = [0, 48], sizes = [16, 16], strides = [1, 1]} : vector<16x96xf32> to vector<16x16xf32>
    %174 = vector.extract_strided_slice %154 {offsets = [0, 80], sizes = [16, 16], strides = [1, 1]} : vector<16x96xf32> to vector<16x16xf32>
    %cst_51 = arith.constant dense<0.000000e+00> : vector<16x16xf32>
    %175 = tpu.matmul %172, %173, %cst_51 {dimension_numbers = #tpu.dot_dimension_numbers<[1], [1], [0], [0], [0, 0, 1, 0], [], []>} : vector<16x16xf32>, vector<16x16xf32>, vector<16x16xf32> -> vector<16x16xf32>
    %176 = arith.addf %175, %28 : vector<16x16xf32>
    %cst_52 = arith.constant dense<0xFF800000> : vector<16xf32>
    %177 = vector.multi_reduction <maximumf>, %176, %cst_52 [1] : vector<16x16xf32> to vector<16xf32>
    %178 = vector.shape_cast %177 : vector<16xf32> to vector<16x1xf32>
    %179 = vector.broadcast %178 : vector<16x1xf32> to vector<16x16xf32>
    %180 = arith.subf %176, %179 : vector<16x16xf32>
    %181 = math.exp %180 : vector<16x16xf32>
    %cst_53 = arith.constant dense<0.000000e+00> : vector<16xf32>
    %182 = vector.multi_reduction <add>, %181, %cst_53 [1] : vector<16x16xf32> to vector<16xf32>
    %183 = vector.shape_cast %182 : vector<16xf32> to vector<16x1xf32>
    %184 = tpu.reciprocal %183 {approx = true} : vector<16x1xf32> -> vector<16x1xf32>
    %185 = vector.broadcast %184 : vector<16x1xf32> to vector<16x16xf32>
    %186 = arith.mulf %181, %185 : vector<16x16xf32>
    %cst_54 = arith.constant dense<0.000000e+00> : vector<16x16xf32>
    %187 = tpu.matmul %186, %174, %cst_54 {dimension_numbers = #tpu.dot_dimension_numbers<[1], [0], [0], [1], [0, 0, 1, 1], [], []>} : vector<16x16xf32>, vector<16x16xf32>, vector<16x16xf32> -> vector<16x16xf32>
    %c0_55 = arith.constant 0 : index
    %c16_56 = arith.constant 16 : index
    %188 = vector.load %arg9[%c0_55, %c16_56] : memref<16x32xf32, #tpu.memory_space<vmem>>, vector<16x16xf32>
    tpu.vector_store %arg9[%c0_55, %c16_56], %187 {strides = array<i32>} : memref<16x32xf32, #tpu.memory_space<vmem>>, vector<16x16xf32>,
    %c0_57 = arith.constant 0 : index
    %c0_58 = arith.constant 0 : index
    %189 = vector.load %arg9[%c0_57, %c0_58] : memref<16x32xf32, #tpu.memory_space<vmem>>, vector<16x32xf32>
    %cst_59 = arith.constant dense<0.000000e+00> : vector<16x32xf32>
    %190 = tpu.matmul %189, %148, %cst_59 {dimension_numbers = #tpu.dot_dimension_numbers<[1], [0], [0], [1], [0, 0, 1, 1], [], []>} : vector<16x32xf32>, vector<32x32xf32>, vector<16x32xf32> -> vector<16x32xf32>
    %191 = vector.extract_strided_slice %0 {offsets = [11, 0], sizes = [1, 32], strides = [1, 1]} : vector<24x256xf32> to vector<1x32xf32>
    %192 = vector.broadcast %191 : vector<1x32xf32> to vector<16x32xf32>
    %193 = arith.addf %190, %192 : vector<16x32xf32>
    %194 = arith.addf %146, %193 : vector<16x32xf32>
    %195 = vector.extract_strided_slice %0 {offsets = [12, 0], sizes = [1, 32], strides = [1, 1]} : vector<24x256xf32> to vector<1x32xf32>
    %196 = vector.extract_strided_slice %0 {offsets = [13, 0], sizes = [1, 32], strides = [1, 1]} : vector<24x256xf32> to vector<1x32xf32>
    %cst_60 = arith.constant dense<0.000000e+00> : vector<16xf32>
    %197 = vector.multi_reduction <add>, %194, %cst_60 [1] : vector<16x32xf32> to vector<16xf32>
    %198 = vector.shape_cast %197 : vector<16xf32> to vector<16x1xf32>
    %cst_61 = arith.constant 3.200000e+01 : f32
    %199 = vector.broadcast %cst_61 : f32 to vector<16x1xf32>
    %200 = arith.divf %198, %199 : vector<16x1xf32>
    %201 = vector.broadcast %200 : vector<16x1xf32> to vector<16x32xf32>
    %202 = arith.subf %194, %201 : vector<16x32xf32>
    %203 = arith.mulf %202, %202 : vector<16x32xf32>
    %cst_62 = arith.constant dense<0.000000e+00> : vector<16xf32>
    %204 = vector.multi_reduction <add>, %203, %cst_62 [1] : vector<16x32xf32> to vector<16xf32>
    %205 = vector.shape_cast %204 : vector<16xf32> to vector<16x1xf32>
    %cst_63 = arith.constant 3.200000e+01 : f32
    %206 = vector.broadcast %cst_63 : f32 to vector<16x1xf32>
    %207 = arith.divf %205, %206 : vector<16x1xf32>
    %208 = vector.broadcast %200 : vector<16x1xf32> to vector<16x32xf32>
    %209 = arith.subf %194, %208 : vector<16x32xf32>
    %cst_64 = arith.constant 9.99999996E-13 : f32
    %210 = vector.broadcast %cst_64 : f32 to vector<16x1xf32>
    %211 = arith.addf %207, %210 : vector<16x1xf32>
    %212 = math.rsqrt %211 : vector<16x1xf32>
    %213 = vector.broadcast %212 : vector<16x1xf32> to vector<16x32xf32>
    %214 = arith.mulf %209, %213 : vector<16x32xf32>
    %215 = vector.broadcast %195 : vector<1x32xf32> to vector<16x32xf32>
    %216 = arith.mulf %214, %215 : vector<16x32xf32>
    %217 = vector.broadcast %196 : vector<1x32xf32> to vector<16x32xf32>
    %218 = arith.addf %216, %217 : vector<16x32xf32>
    %cst_65 = arith.constant dense<0.000000e+00> : vector<16x64xf32>
    %219 = tpu.matmul %218, %149, %cst_65 {dimension_numbers = #tpu.dot_dimension_numbers<[1], [0], [0], [1], [0, 0, 1, 1], [], []>} : vector<16x32xf32>, vector<32x64xf32>, vector<16x64xf32> -> vector<16x64xf32>
    %220 = vector.extract_strided_slice %0 {offsets = [14, 0], sizes = [1, 64], strides = [1, 1]} : vector<24x256xf32> to vector<1x64xf32>
    %221 = vector.broadcast %220 : vector<1x64xf32> to vector<16x64xf32>
    %222 = arith.addf %219, %221 : vector<16x64xf32>
    %cst_66 = arith.constant 5.000000e-01 : f32
    %223 = vector.broadcast %cst_66 : f32 to vector<16x64xf32>
    %224 = arith.mulf %223, %222 : vector<16x64xf32>
    %cst_67 = arith.constant 4.471500e-02 : f32
    %225 = vector.broadcast %cst_67 : f32 to vector<16x64xf32>
    %226 = arith.mulf %225, %222 : vector<16x64xf32>
    %227 = arith.mulf %226, %222 : vector<16x64xf32>
    %228 = arith.mulf %227, %222 : vector<16x64xf32>
    %229 = arith.addf %222, %228 : vector<16x64xf32>
    %cst_68 = arith.constant 0.797884583 : f32
    %230 = vector.broadcast %cst_68 : f32 to vector<16x64xf32>
    %231 = arith.mulf %230, %229 : vector<16x64xf32>
    %232 = math.tanh %231 : vector<16x64xf32>
    %cst_69 = arith.constant 1.000000e+00 : f32
    %233 = vector.broadcast %cst_69 : f32 to vector<16x64xf32>
    %234 = arith.addf %233, %232 : vector<16x64xf32>
    %235 = arith.mulf %224, %234 : vector<16x64xf32>
    %cst_70 = arith.constant dense<0.000000e+00> : vector<16x32xf32>
    %236 = tpu.matmul %235, %150, %cst_70 {dimension_numbers = #tpu.dot_dimension_numbers<[1], [0], [0], [1], [0, 0, 1, 1], [], []>} : vector<16x64xf32>, vector<64x32xf32>, vector<16x32xf32> -> vector<16x32xf32>
    %237 = vector.extract_strided_slice %0 {offsets = [15, 0], sizes = [1, 32], strides = [1, 1]} : vector<24x256xf32> to vector<1x32xf32>
    %238 = vector.broadcast %237 : vector<1x32xf32> to vector<16x32xf32>
    %239 = arith.addf %236, %238 : vector<16x32xf32>
    %240 = arith.addf %218, %239 : vector<16x32xf32>
    %241 = vector.extract_strided_slice %0 {offsets = [16, 0], sizes = [1, 32], strides = [1, 1]} : vector<24x256xf32> to vector<1x32xf32>
    %242 = vector.extract_strided_slice %0 {offsets = [17, 0], sizes = [1, 32], strides = [1, 1]} : vector<24x256xf32> to vector<1x32xf32>
    %cst_71 = arith.constant dense<0.000000e+00> : vector<16xf32>
    %243 = vector.multi_reduction <add>, %240, %cst_71 [1] : vector<16x32xf32> to vector<16xf32>
    %244 = vector.shape_cast %243 : vector<16xf32> to vector<16x1xf32>
    %cst_72 = arith.constant 3.200000e+01 : f32
    %245 = vector.broadcast %cst_72 : f32 to vector<16x1xf32>
    %246 = arith.divf %244, %245 : vector<16x1xf32>
    %247 = vector.broadcast %246 : vector<16x1xf32> to vector<16x32xf32>
    %248 = arith.subf %240, %247 : vector<16x32xf32>
    %249 = arith.mulf %248, %248 : vector<16x32xf32>
    %cst_73 = arith.constant dense<0.000000e+00> : vector<16xf32>
    %250 = vector.multi_reduction <add>, %249, %cst_73 [1] : vector<16x32xf32> to vector<16xf32>
    %251 = vector.shape_cast %250 : vector<16xf32> to vector<16x1xf32>
    %cst_74 = arith.constant 3.200000e+01 : f32
    %252 = vector.broadcast %cst_74 : f32 to vector<16x1xf32>
    %253 = arith.divf %251, %252 : vector<16x1xf32>
    %254 = vector.broadcast %246 : vector<16x1xf32> to vector<16x32xf32>
    %255 = arith.subf %240, %254 : vector<16x32xf32>
    %cst_75 = arith.constant 9.99999996E-13 : f32
    %256 = vector.broadcast %cst_75 : f32 to vector<16x1xf32>
    %257 = arith.addf %253, %256 : vector<16x1xf32>
    %258 = math.rsqrt %257 : vector<16x1xf32>
    %259 = vector.broadcast %258 : vector<16x1xf32> to vector<16x32xf32>
    %260 = arith.mulf %255, %259 : vector<16x32xf32>
    %261 = vector.broadcast %241 : vector<1x32xf32> to vector<16x32xf32>
    %262 = arith.mulf %260, %261 : vector<16x32xf32>
    %263 = vector.broadcast %242 : vector<1x32xf32> to vector<16x32xf32>
    %264 = arith.addf %262, %263 : vector<16x32xf32>
    %265 = vector.shape_cast %264 : vector<16x32xf32> to vector<2x8x32xf32>
    %266 = vector.extract_strided_slice %265 {offsets = [0, 0, 0], sizes = [2, 1, 32], strides = [1, 1, 1]} : vector<2x8x32xf32> to vector<2x1x32xf32>
    %267 = vector.shape_cast %266 : vector<2x1x32xf32> to vector<2x32xf32>
    %268 = vector.extract_strided_slice %1 {offsets = [0, 384], sizes = [32, 32], strides = [1, 1]} : vector<32x672xf32> to vector<32x32xf32>
    %cst_76 = arith.constant dense<0.000000e+00> : vector<2x32xf32>
    %269 = tpu.matmul %267, %268, %cst_76 {dimension_numbers = #tpu.dot_dimension_numbers<[1], [0], [0], [1], [0, 0, 1, 1], [], []>} : vector<2x32xf32>, vector<32x32xf32>, vector<2x32xf32> -> vector<2x32xf32>
    %270 = vector.extract_strided_slice %0 {offsets = [18, 0], sizes = [1, 32], strides = [1, 1]} : vector<24x256xf32> to vector<1x32xf32>
    %271 = vector.broadcast %270 : vector<1x32xf32> to vector<2x32xf32>
    %272 = arith.addf %269, %271 : vector<2x32xf32>
    %273 = math.tanh %272 : vector<2x32xf32>
    %274 = vector.extract_strided_slice %1 {offsets = [0, 416], sizes = [32, 256], strides = [1, 1]} : vector<32x672xf32> to vector<32x256xf32>
    %cst_77 = arith.constant dense<0.000000e+00> : vector<2x256xf32>
    %275 = tpu.matmul %273, %274, %cst_77 {dimension_numbers = #tpu.dot_dimension_numbers<[1], [0], [0], [1], [0, 0, 1, 1], [], []>} : vector<2x32xf32>, vector<32x256xf32>, vector<2x256xf32> -> vector<2x256xf32>
    %276 = vector.extract_strided_slice %0 {offsets = [19, 0], sizes = [1, 256], strides = [1, 1]} : vector<24x256xf32> to vector<1x256xf32>
    %277 = vector.broadcast %276 : vector<1x256xf32> to vector<2x256xf32>
    %278 = arith.addf %275, %277 : vector<2x256xf32>
    %cst_78 = arith.constant 0.000000e+00 : f32
    %279 = vector.broadcast %cst_78 : f32 to vector<2x256xf32>
    %280 = arith.maximumf %278, %279 : vector<2x256xf32>
    %c0_79 = arith.constant 0 : index
    %c0_80 = arith.constant 0 : index
    %281 = vector.load %arg5[%c0_79, %c0_80] : memref<256x64xf32, #tpu.memory_space<vmem>>, vector<256x64xf32>
    %cst_81 = arith.constant dense<0.000000e+00> : vector<2x64xf32>
    %282 = tpu.matmul %280, %281, %cst_81 {dimension_numbers = #tpu.dot_dimension_numbers<[1], [0], [0], [1], [0, 0, 1, 1], [], []>} : vector<2x256xf32>, vector<256x64xf32>, vector<2x64xf32> -> vector<2x64xf32>
    %283 = vector.extract_strided_slice %0 {offsets = [20, 0], sizes = [1, 64], strides = [1, 1]} : vector<24x256xf32> to vector<1x64xf32>
    %284 = vector.broadcast %283 : vector<1x64xf32> to vector<2x64xf32>
    %285 = arith.addf %282, %284 : vector<2x64xf32>
    %cst_82 = arith.constant 0.000000e+00 : f32
    %286 = vector.broadcast %cst_82 : f32 to vector<2x64xf32>
    %287 = arith.maximumf %285, %286 : vector<2x64xf32>
    %288 = vector.extract_strided_slice %2 {offsets = [0, 64], sizes = [64, 16], strides = [1, 1]} : vector<64x80xf32> to vector<64x16xf32>
    %cst_83 = arith.constant dense<0.000000e+00> : vector<2x16xf32>
    %289 = tpu.matmul %287, %288, %cst_83 {dimension_numbers = #tpu.dot_dimension_numbers<[1], [0], [0], [1], [0, 0, 1, 1], [], []>} : vector<2x64xf32>, vector<64x16xf32>, vector<2x16xf32> -> vector<2x16xf32>
    %290 = vector.extract_strided_slice %0 {offsets = [21, 0], sizes = [1, 16], strides = [1, 1]} : vector<24x256xf32> to vector<1x16xf32>
    %291 = vector.broadcast %290 : vector<1x16xf32> to vector<2x16xf32>
    %292 = arith.addf %289, %291 : vector<2x16xf32>
    %cst_84 = arith.constant 0.000000e+00 : f32
    %293 = vector.broadcast %cst_84 : f32 to vector<2x16xf32>
    %294 = arith.maximumf %292, %293 : vector<2x16xf32>
    %c0_85 = arith.constant 0 : index
    %c0_86 = arith.constant 0 : index
    %295 = vector.load %arg6[%c0_85, %c0_86] : memref<16x128xf32, #tpu.memory_space<vmem>>, vector<16x128xf32>
    %cst_87 = arith.constant dense<0.000000e+00> : vector<2x128xf32>
    %296 = tpu.matmul %294, %295, %cst_87 {dimension_numbers = #tpu.dot_dimension_numbers<[1], [0], [0], [1], [0, 0, 1, 1], [], []>} : vector<2x16xf32>, vector<16x128xf32>, vector<2x128xf32> -> vector<2x128xf32>
    %297 = vector.extract_strided_slice %0 {offsets = [22, 0], sizes = [1, 128], strides = [1, 1]} : vector<24x256xf32> to vector<1x128xf32>
    %298 = vector.broadcast %297 : vector<1x128xf32> to vector<2x128xf32>
    %299 = arith.addf %296, %298 : vector<2x128xf32>
    %cst_88 = arith.constant dense<0xFF800000> : vector<2xf32>
    %300 = vector.multi_reduction <maximumf>, %299, %cst_88 [1] : vector<2x128xf32> to vector<2xf32>
    %301 = vector.shape_cast %300 : vector<2xf32> to vector<2x1xf32>
    %302 = vector.broadcast %301 : vector<2x1xf32> to vector<2x128xf32>
    %303 = arith.subf %299, %302 : vector<2x128xf32>
    %304 = math.exp %303 : vector<2x128xf32>
    %cst_89 = arith.constant dense<0.000000e+00> : vector<2xf32>
    %305 = vector.multi_reduction <add>, %304, %cst_89 [1] : vector<2x128xf32> to vector<2xf32>
    %306 = vector.shape_cast %305 : vector<2xf32> to vector<2x1xf32>
    %307 = math.log %306 : vector<2x1xf32>
    %308 = vector.broadcast %307 : vector<2x1xf32> to vector<2x128xf32>
    %309 = arith.subf %303, %308 : vector<2x128xf32>
    %c0_90 = arith.constant 0 : index
    %c0_91 = arith.constant 0 : index
    %310 = vector.load %arg8[%c0_90, %c0_91] : memref<2x256xf32, #tpu.memory_space<vmem>>, vector<2x128xf32>
    tpu.vector_store %arg8[%c0_90, %c0_91], %309 {strides = array<i32>} : memref<2x256xf32, #tpu.memory_space<vmem>>, vector<2x128xf32>,
    %c0_92 = arith.constant 0 : index
    %c128 = arith.constant 128 : index
    %311 = vector.load %arg8[%c0_92, %c128] : memref<2x256xf32, #tpu.memory_space<vmem>>, vector<2x128xf32>
    tpu.vector_store %arg8[%c0_92, %c128], %299 {strides = array<i32>} : memref<2x256xf32, #tpu.memory_space<vmem>>, vector<2x128xf32>,
    return
  }
  func.func @transform_0(%arg0: i32) -> (i32, i32) {
    %c0_i32 = arith.constant 0 : i32
    %c0_i32_0 = arith.constant 0 : i32
    %c0_i32_1 = arith.constant 0 : i32
    return %c0_i32, %c0_i32_0 : i32, i32
  }
  func.func @transform_1(%arg0: i32) -> (i32, i32) {
    %c0_i32 = arith.constant 0 : i32
    %c0_i32_0 = arith.constant 0 : i32
    %c0_i32_1 = arith.constant 0 : i32
    return %c0_i32, %c0_i32_0 : i32, i32
  }
  func.func @transform_2(%arg0: i32) -> (i32, i32) {
    %c0_i32 = arith.constant 0 : i32
    %c0_i32_0 = arith.constant 0 : i32
    %c0_i32_1 = arith.constant 0 : i32
    return %c0_i32, %c0_i32_0 : i32, i32
  }
  func.func @transform_3(%arg0: i32) -> (i32, i32) {
    %c0_i32 = arith.constant 0 : i32
    %c0_i32_0 = arith.constant 0 : i32
    %c0_i32_1 = arith.constant 0 : i32
    return %c0_i32, %c0_i32_0 : i32, i32
  }
  func.func @transform_4(%arg0: i32) -> (i32, i32) {
    %c0_i32 = arith.constant 0 : i32
    %c0_i32_0 = arith.constant 0 : i32
    %c0_i32_1 = arith.constant 0 : i32
    return %c0_i32, %c0_i32_0 : i32, i32
  }
  func.func @transform_5(%arg0: i32) -> (i32, i32) {
    %c0_i32 = arith.constant 0 : i32
    %c0_i32_0 = arith.constant 0 : i32
    %c0_i32_1 = arith.constant 0 : i32
    return %c0_i32, %c0_i32_0 : i32, i32
  }
  func.func @transform_6(%arg0: i32) -> (i32, i32) {
    %c0_i32 = arith.constant 0 : i32
    %c0_i32_0 = arith.constant 0 : i32
    %c0_i32_1 = arith.constant 0 : i32
    return %c0_i32, %c0_i32_0 : i32, i32
  }
  func.func @transform_7(%arg0: i32) -> (i32, i32) {
    %c0_i32 = arith.constant 0 : i32
    %c0_i32_0 = arith.constant 0 : i32
    %c0_i32_1 = arith.constant 0 : i32
    return %c0_i32, %c0_i32_0 : i32, i32
  }
}

</mosaic_0001>

<bundles_post_ra>
// kernel: model_forward.1
= control target key start
LH: loop header
LB: loop body
LE: loop exit
PB: predicated region body
PF: predicated region fallthrough
CT: control target
= control target key end

     0   :  { %vm64_vm0 = vcmask 261120   ;;  %v92_v23 = vlaneseq  ;;  %vm197_vm1 = vcmask 130048   ;;  %s3227_s14 = smov 80   ;;  %s3228_s15 = smov 96   ;;  %vm600_vm3 = vcmask 261248   ;;  %s3900_s0 = inlined_call_operand.vmem [shape: f32[16,32], index: 0, kind: input, shape index: {}]   ;;  %s3901_s2 = inlined_call_operand.vmem [shape: f32[32,672], index: 2, kind: input, shape index: {}]   ;;  %s3902_s6 = inlined_call_operand.vmem [shape: f32[24,256], index: 6, kind: input, shape index: {}]   ;;  %s3903_s1 = inlined_call_operand.vmem [shape: f32[16,16], index: 1, kind: input, shape index: {}]   ;;  %s3904_s3 = inlined_call_operand.vmem [shape: f32[64,80], index: 3, kind: input, shape index: {}]   ;;  %s3905_s4 = inlined_call_operand.vmem [shape: f32[256,64], index: 4, kind: input, shape index: {}]   ;;  %s3906_s5 = inlined_call_operand.vmem [shape: f32[16,128], index: 5, kind: input, shape index: {}]   ;;  %s3907_s7 = inlined_call_operand.vmem [shape: f32[2,256], index: 7, kind: output, shape index: {}]  }
   0x1   :  { %v62_v0 = vld [vmem:[%s3900_s0] sm:$0xff]  ;;  %v63_v1 = vld [vmem:[%s3900_s0 + $0x8] sm:$0xff]  ;;  %v3295_v15 = vld [vmem:[%s3901_s2 + $0x30] sm:$0xff]  ;;  %s3229_s16 = smov 112   ;;  %s3231_s21 = smov 64   ;;  %vm853_vm4 = vcmask 523264  }
   0x2   :  { %v65_v2 = vsel %vm64_vm0, %v62_v0, 0.0  ;;  %v68_v3 = vsel %vm64_vm0, %v63_v1, 0.0  ;;  %v3290_v14 = vld [vmem:[%s3901_s2] sm:$0xff]  ;;  %v3309_v19 = vld [vmem:[%s3901_s2 + $0x90] sm:$0xff]  ;;  %v3313_v27 = vshrl.u32 %v92_v23, 7  ;;  %vm3354_vm2 = vmpackc.low %vm197_vm1, %vm197_vm1  ;;  %s3232_s22 = smov 32  }
   0x3   :  { %66 = vadd.xlane.f32.xlu0 %v65_v2  ;;  %v3300_v16 = vld [vmem:[%s3901_s2 + $0x60] sm:$0xff]  ;;  %v3023_v17 = vpack.i.bf16 %v3295_v15, %v3290_v14  ;;  %v2812_v18 = vpack.c.bf16 %v3295_v15, %v3290_v14  ;;  %v3372_v60 = vld [vmem:[%s3903_s1 + $0x8] sm:$0xff]  ;;  %s3233_s23 = smov 16   ;;  %vm3235_vm5 = vmmov 0   ;;  %vm2031_vm6 = vcmask 785408  }
   0x4   :  { %v2816_v20 = vpack.c.bf16 %v3309_v19, %v3300_v16  ;;  %v3316_v29 = vsub.s32 0, %v3313_v27  ;;  %v3321_v30 = vld [vmem:[%s3902_s6] sm:$0xff]  ;;  %v3324_v31 = vsub.s32 1, %v3313_v27  ;;  %v3339_v42 = vsub.s32 2, %v3313_v27 }
   0x5   :  { %2813 = vmatprep.subr.bf16.mxu1 %v2812_v18  ;;  %v3377_v61 = vld [vmem:[%s3903_s1] sm:$0xff]  ;;  %s3230_s1 = smov 48   ;;  %v3028_v14 = vpack.i.bf16 %v3309_v19, %v3300_v16  ;;  %v3413_v16 = vsub.s32 3, %v3313_v27  ;;  %vm1912_vm7 = vcmask 1041409   ;;  %vm2412_vm8 = vcmask 1041408  }
   0x6   :  { %2815 = vmatpush3.bf16.msra.mxu1 %v2812_v18  ;;  %v95_v32 = vrot.slane %v3321_v30, %v3316_v29  ;;  %v101_v35 = vrot.slane %v3321_v30, %v3324_v31  ;;  %v109_v43 = vrot.slane %v3321_v30, %v3339_v42 }
   0x7   :  { %69 = vadd.xlane.f32.xlu0 %v68_v3  ;;  %2817 = vmatprep.subr.bf16.mxu1 %v2816_v20  ;;  %v608_v19 = vrot.slane %v3321_v30, %v3413_v16 }
   0xa   :  { %2819 = vmatpush3.bf16.msra.mxu1 %v2816_v20 }
  0x90   :  { %v67_v4 = vpop.xlane.xlu0 %66 }
  0x91   :  { %v72_v5 = vmul.f32 0.03125, %v67_v4 }
  0x93   :  { %v74_v6 = vsub.f32 %v62_v0, %v72_v5 }
  0x94   :  { %v70_v7 = vpop.xlane.xlu0 %69 }
  0x95   :  { %v73_v8 = vmul.f32 0.03125, %v70_v7  ;;  %v76_v9 = vmul.f32 %v74_v6, %v74_v6 }
  0x97   :  { %v75_v10 = vsub.f32 %v63_v1, %v73_v8  ;;  %v78_v11 = vsel %vm64_vm0, %v76_v9, 0.0 }
  0x98   :  { %79 = vadd.xlane.f32.xlu1 %v78_v11 }
  0x99   :  { %v77_v12 = vmul.f32 %v75_v10, %v75_v10 }
  0x9b   :  { %v81_v13 = vsel %vm64_vm0, %v77_v12, 0.0 }
  0x9c   :  { %82 = vadd.xlane.f32.xlu1 %v81_v13 }
 0x125   :  { %v80_v21 = vpop.xlane.xlu1 %79 }
 0x126   :  { %v84_v22 = vmul.f32 0.03125, %v80_v21 }
 0x128   :  { %v86_v24 = vadd.f32 1e-12, %v84_v22 }
 0x129   :  { %v83_v25 = vpop.xlane.xlu1 %82 }
 0x12a   :  { %3153 = vrsqrt.f32 %v86_v24  ;;  %v85_v26 = vmul.f32 0.03125, %v83_v25 }
 0x12c   :  { %v87_v28 = vadd.f32 1e-12, %v85_v26 }
 0x12e   :  { %3155 = vrsqrt.f32 %v87_v28 }
 0x134   :  { %v3154_v33 = vpop.eup %3153 }
 0x135   :  { %v90_v34 = vmul.f32 %v3154_v33, %v74_v6 }
 0x137   :  { %v96_v36 = vmul.f32 %v95_v32, %v90_v34 }
 0x138   :  { %v3156_v37 = vpop.eup %3155 }
 0x139   :  { %v91_v38 = vmul.f32 %v3156_v37, %v75_v10  ;;  %v3330_v39 = vadd.f32 %v101_v35, %v96_v36 }
 0x13b   :  { %v97_v40 = vmul.f32 %v95_v32, %v91_v38  ;;  %2623 = vmatprep.mubr.msk.f32.mxu1 %vm64_vm0, %v3330_v39 }
 0x13d   :  { %v3334_v41 = vadd.f32 %v101_v35, %v97_v40 }
 0x13f   :  { %2624 = vmatmul.mubr.msk.f32.vlgmr.msra.gmra.mrb[0].mxu1 %vm64_vm0, %v3334_v41 }
 0x212   :  { %v2625_v44 = vpop.f32.mrb[0].mxu1 }
 0x213   :  { %v188_v45 = vadd.f32 %v2625_v44, %v109_v43  ;;  %v182_v46 = vpop.f32.mrb[1].mxu1 }
 0x214   :  { %v183_v47 = vadd.f32 %v182_v46, %v109_v43 }
 0x216   :  { %2630 = vmatprep.mubr.msk.f32.mxu1 %vm197_vm1, %v183_v47  ;;  %v3344_v48 = vpack.i.bf16 %v188_v45, %v183_v47 }
 0x218   :  { %3009 = vrot.lane.b32.xlu1 %v3344_v48, %s3227_s14  ;;  %3004 = vrot.lane.b32.xlu0 %v3344_v48, %s3228_s15 }
 0x21c   :  { %392 = vrot.lane.b32.xlu1 %v183_v47, %s3229_s16 }
 0x220   :  { %394 = vrot.lane.b32.xlu1 %v188_v45, %s3229_s16 }
 0x28a   :  { %v3010_v49 = vpop.permute.xlu1 %3009  ;;  %v3005_v50 = vpop.permute.xlu0 %3004 }
 0x28b   :  { %v3012_v51 = vunpack.i.h.bf16 %v3010_v49  ;;  %v3011_v52 = vunpack.i.l.bf16 %v3010_v49  ;;  %v3007_v53 = vunpack.i.h.bf16 %v3005_v50  ;;  %v3006_v54 = vunpack.i.l.bf16 %v3005_v50 }
 0x28d   :  { %v2820_v56 = vpack.c.bf16 %v3007_v53, %v3006_v54  ;;  %v2830_v57 = vpack.c.bf16 %v3012_v51, %v3011_v52 }
 0x28e   :  { %v393_v58 = vpop.permute.xlu1 %392 }
 0x28f   :  { %2822 = vmatprep.subr.msk.bf16.mxu1 %vm3354_vm2, %v2820_v56 }
 0x290   :  { %2825 = vmatpush3.bf16.xpose.msk.msra.mxu1 %vm3354_vm2, %v2820_v56 }
 0x291   :  { %2832 = vmatprep.subr.msk.bf16.mxu1 %vm3354_vm2, %v2830_v57 }
 0x292   :  { %v395_v59 = vpop.permute.xlu1 %394 }
 0x297   :  { %2631 = vmatmul.mubr.msk.f32.vlgmr.msra.gmra.mrb[2].mxu1 %vm197_vm1, %v188_v45 }
 0x298   :  { %2835 = vmatpush3.bf16.xpose.msk.msra.mxu1 %vm3354_vm2, %v2830_v57  ;;  %2644 = vmatprep.mubr.msk.f32.mxu1 %vm197_vm1, %v393_v58 }
 0x29f   :  { %2645 = vmatmul.mubr.msk.f32.vlgmr.msra.gmra.mrb[4].mxu1 %vm197_vm1, %v395_v59 }
 0x36a   :  { %v2632_v62 = vpop.f32.mrb[2].mxu1 }
 0x36b   :  { %v278_v63 = vadd.f32 %v2632_v62, %v3372_v60  ;;  %v272_v0 = vpop.f32.mrb[3].mxu1 }
 0x36c   :  { %v273_v1 = vadd.f32 %v272_v0, %v3377_v61 }
 0x36d   :  { %v284_v2 = vsel %vm197_vm1, %v278_v63, -inf }
 0x36e   :  { %285 = vmax.xlane.f32.xlu1 %v284_v2  ;;  %v281_v3 = vsel %vm197_vm1, %v273_v1, -inf }
 0x36f   :  { %282 = vmax.xlane.f32.xlu0 %v281_v3 }
 0x372   :  { %v2646_v4 = vpop.f32.mrb[4].mxu1 }
 0x373   :  { %v474_v5 = vpop.f32.mrb[5].mxu1  ;;  %v480_v7 = vadd.f32 %v2646_v4, %v3372_v60 }
 0x374   :  { %v475_v6 = vadd.f32 %v474_v5, %v3377_v61 }
 0x375   :  { %v486_v9 = vsel %vm197_vm1, %v480_v7, -inf }
 0x376   :  { %v483_v8 = vsel %vm197_vm1, %v475_v6, -inf }
 0x377   :  { %484 = vmax.xlane.f32.xlu0 %v483_v8 }
 0x37b   :  { %487 = vmax.xlane.f32.xlu0 %v486_v9 }
 0x3fb   :  { %v286_v10 = vpop.xlane.xlu1 %285 }
 0x3fc   :  { %v288_v11 = vsub.f32 %v278_v63, %v286_v10  ;;  %v283_v12 = vpop.xlane.xlu0 %282 }
 0x3fd   :  { %v287_v13 = vsub.f32 %v273_v1, %v283_v12 }
 0x3fe   :  { %v291_v18 = vmul.f32 1.442695, %v288_v11 }
 0x3ff   :  { %v289_v20 = vmul.f32 1.442695, %v287_v13 }
 0x400   :  { %3157 = vpow2.f32 %v291_v18 }
 0x401   :  { %3159 = vpow2.f32 %v289_v20 }
 0x404   :  { %v485_v21 = vpop.xlane.xlu0 %484 }
 0x405   :  { %v489_v22 = vsub.f32 %v475_v6, %v485_v21 }
 0x407   :  { %v491_v23 = vmul.f32 1.442695, %v489_v22 }
 0x408   :  { %v488_v24 = vpop.xlane.xlu0 %487 }
 0x409   :  { %3161 = vpow2.f32 %v491_v23  ;;  %v490_v25 = vsub.f32 %v480_v7, %v488_v24 }
 0x40a   :  { %v3158_v26 = vpop.eup %3157 }
 0x40b   :  { %v3160_v28 = vpop.eup %3159  ;;  %v493_v32 = vmul.f32 1.442695, %v490_v25  ;;  %v296_v33 = vsel %vm197_vm1, %v3158_v26, 0.0 }
 0x40c   :  { %297 = vadd.xlane.f32.xlu1 %v296_v33  ;;  %v293_v34 = vsel %vm197_vm1, %v3160_v28, 0.0 }
 0x40d   :  { %3163 = vpow2.f32 %v493_v32  ;;  %294 = vadd.xlane.f32.xlu0 %v293_v34 }
 0x413   :  { %v3162_v35 = vpop.eup %3161 }
 0x414   :  { %v495_v36 = vsel %vm197_vm1, %v3162_v35, 0.0 }
 0x415   :  { %496 = vadd.xlane.f32.xlu0 %v495_v36 }
 0x417   :  { %v3164_v37 = vpop.eup %3163 }
 0x418   :  { %v498_v38 = vsel %vm197_vm1, %v3164_v37, 0.0 }
 0x419   :  { %499 = vadd.xlane.f32.xlu1 %v498_v38 }
 0x42a   :  { %3019 = vrot.lane.b32.xlu1 %v3344_v48, %s3230_s1 }
 0x42b   :  { %3014 = vrot.lane.b32.xlu0 %v3344_v48, %s3231_s21 }
 0x42e   :  { %3024 = vrot.lane.b32.xlu1 %v3023_v17, %s3232_s22 }
 0x499   :  { %v298_v43 = vpop.xlane.xlu1 %297 }
 0x49a   :  { %v295_v40 = vpop.xlane.xlu0 %294 }
 0x49b   :  { %3165 = vrcp.f32 %v295_v40 }
 0x49c   :  { %3167 = vrcp.f32 %v298_v43 }
 0x4a2   :  { %v497_v44 = vpop.xlane.xlu0 %496 }
 0x4a3   :  { %3169 = vrcp.f32 %v497_v44  ;;  %v3431_v44 = vld [vmem:[%s3901_s2 + $0x38] sm:$0xff] }
 0x4a5   :  { %v3166_v45 = vpop.eup %3165 }
 0x4a6   :  { %v500_v46 = vpop.xlane.xlu1 %499  ;;  %v3015_v47 = vpop.permute.xlu0 %3014  ;;  %v301_v49 = vmul.f32 %v3166_v45, %v3160_v28 }
 0x4a7   :  { %3171 = vrcp.f32 %v500_v46  ;;  %v3017_v50 = vunpack.i.h.bf16 %v3015_v47  ;;  %v3016_v51 = vunpack.i.l.bf16 %v3015_v47  ;;  %v3168_v53 = vpop.eup %3167  ;;  %v3438_v46 = vld [vmem:[%s3901_s2 + $0x68] sm:$0xff]  ;;  %v3443_v47 = vld [vmem:[%s3901_s2 + $0x98] sm:$0xff] }
 0x4a8   :  { %2637 = vmatprep.mubr.msk.f32.mxu0 %vm197_vm1, %v301_v49  ;;  %v302_v59 = vmul.f32 %v3168_v53, %v3158_v26  ;;  %v2852_v49 = vpack.c.bf16 %v3443_v47, %v3438_v46 }
 0x4a9   :  { %v2826_v52 = vpack.c.bf16 %v3017_v50, %v3016_v51 }
 0x4aa   :  { %v3020_v54 = vpop.permute.xlu1 %3019 }
 0x4ab   :  { %v3022_v56 = vunpack.i.h.bf16 %v3020_v54  ;;  %v3021_v48 = vunpack.i.l.bf16 %v3020_v54  ;;  %2827 = vmatprep.subr.bf16.mxu0 %v2826_v52 }
 0x4ac   :  { %2829 = vmatpush3.bf16.msra.mxu0 %v2826_v52 }
 0x4ad   :  { %v3170_v57 = vpop.eup %3169  ;;  %v2836_v58 = vpack.c.bf16 %v3022_v56, %v3021_v48  ;;  %v3448_v48 = vsub.s32 4, %v3313_v27 }
 0x4ae   :  { %v503_v62 = vmul.f32 %v3170_v57, %v3162_v35  ;;  %v3025_v1 = vpop.permute.xlu1 %3024  ;;  %v3451_v57 = vsub.s32 5, %v3313_v27 }
 0x4af   :  { %2638 = vmatmul.mubr.msk.f32.vlgmr.msra.gmra.mrb[0].mxu0 %vm197_vm1, %v302_v59  ;;  %2837 = vmatprep.subr.bf16.mxu0 %v2836_v58  ;;  %v3027_v2 = vunpack.i.h.bf16 %v3025_v1  ;;  %v3026_v3 = vunpack.i.l.bf16 %v3025_v1 }
 0x4b0   :  { %2839 = vmatpush3.bf16.msra.mxu0 %v2836_v58  ;;  %2651 = vmatprep.mubr.msk.f32.mxu0 %vm197_vm1, %v503_v62  ;;  %v737_v58 = vrot.slane %v3321_v30, %v3448_v48 }
 0x4b1   :  { %v3172_v63 = vpop.eup %3171  ;;  %v2840_v4 = vpack.c.bf16 %v3027_v2, %v3026_v3 }
 0x4b2   :  { %v504_v0 = vmul.f32 %v3172_v63, %v3164_v37  ;;  %v743_v63 = vrot.slane %v3321_v30, %v3451_v57 }
 0x4b3   :  { %2841 = vmatprep.subr.bf16.mxu0 %v2840_v4 }
 0x4b4   :  { %2652 = vmatmul.mubr.msk.f32.vlgmr.msra.gmra.mrb[2].mxu0 %vm197_vm1, %v504_v0 }
 0x4b5   :  { %2843 = vmatpush3.bf16.msra.mxu0 %v2840_v4 }
 0x582   :  { %v2639_v5 = vpop.f32.mrb[0].mxu0 }
 0x583   :  { %391 = vst.msk [vmem:[#allocation2 + $0x8] sm:$0xff] %vm197_vm1, %v2639_v5  ;;  %v381_v6 = vpop.f32.mrb[1].mxu0 }
 0x584   :  { %390 = vst.msk [vmem:[#allocation2] sm:$0xff] %vm197_vm1, %v381_v6  ;;  %v3462_v6 = vld [vmem:[%s3904_s3] sm:$0xff] }
 0x587   :  { %v2653_v7 = vpop.f32.mrb[2].mxu0 }
 0x588   :  { %596 = vrot.lane.b32.xlu0 %v2653_v7, %s3233_s23  ;;  %v583_v8 = vpop.f32.mrb[3].mxu0  ;;  %v3467_v7 = vld [vmem:[%s3904_s3 + $0x8] sm:$0xff] }
 0x589   :  { %594 = vrot.lane.b32.xlu1 %v583_v8, %s3233_s23  ;;  %v2856_v8 = vpack.c.bf16 %v3467_v7, %v3462_v6 }
 0x58d   :  { %3029 = vrot.lane.b32.xlu1 %v3028_v14, %s3232_s22  ;;  %v3474_v14 = vld [vmem:[%s3904_s3 + $0x10] sm:$0xff] }
 0x5fa   :  { %v597_v15 = vpop.permute.xlu0 %596 }
 0x5fb   :  { %602 = vst.msk [vmem:[#allocation2 + $0x8] sm:$0xff] %vm600_vm3, %v597_v15  ;;  %v595_v17 = vpop.permute.xlu1 %594  ;;  %v3479_v15 = vld [vmem:[%s3904_s3 + $0x18] sm:$0xff] }
 0x5fc   :  { %601 = vst.msk [vmem:[#allocation2] sm:$0xff] %vm600_vm3, %v595_v17  ;;  %v3484_v17 = vld [vmem:[%s3904_s3 + $0x20] sm:$0xff] }
 0x5ff   :  { %v3030_v9 = vpop.permute.xlu1 %3029 }
 0x600   :  { %v3032_v10 = vunpack.i.h.bf16 %v3030_v9  ;;  %v3031_v11 = vunpack.i.l.bf16 %v3030_v9  ;;  %v2860_v9 = vpack.c.bf16 %v3479_v15, %v3474_v14 }
 0x602   :  { %v2844_v12 = vpack.c.bf16 %v3032_v10, %v3031_v11  ;;  %v604_v18 = vld [vmem:[#allocation2 + $0x8] sm:$0xff] }
 0x603   :  { %v603_v13 = vld [vmem:[#allocation2] sm:$0xff]  ;;  %v3491_v10 = vld [vmem:[%s3904_s3 + $0x28] sm:$0xff] }
 0x604   :  { %2845 = vmatprep.subr.bf16.mxu0 %v2844_v12  ;;  %2662 = vmatprep.mubr.msk.f32.mxu0 %vm64_vm0, %v603_v13  ;;  %v2864_v11 = vpack.c.bf16 %v3491_v10, %v3484_v17  ;;  %v3503_v13 = vld [vmem:[%s3904_s3 + $0x38] sm:$0xff] }
 0x605   :  { %2847 = vmatpush3.bf16.msra.mxu0 %v2844_v12  ;;  %v3498_v12 = vld [vmem:[%s3904_s3 + $0x30] sm:$0xff] }
 0x606   :  { %2857 = vmatprep.subr.bf16.mxu0 %v2856_v8 }
 0x608   :  { %2663 = vmatmul.mubr.msk.f32.vlgmr.msra.gmra.mrb[4].mxu0 %vm64_vm0, %v604_v18  ;;  %v2868_v18 = vpack.c.bf16 %v3503_v13, %v3498_v12 }
 0x609   :  { %2859 = vmatpush3.bf16.msra.mxu0 %v2856_v8 }
 0x60a   :  { %2861 = vmatprep.subr.bf16.mxu0 %v2860_v9 }
 0x60d   :  { %2863 = vmatpush3.bf16.msra.mxu0 %v2860_v9 }
 0x60e   :  { %2865 = vmatprep.subr.bf16.mxu0 %v2864_v11 }
 0x611   :  { %2867 = vmatpush3.bf16.msra.mxu0 %v2864_v11 }
 0x612   :  { %2869 = vmatprep.subr.bf16.mxu0 %v2868_v18 }
 0x615   :  { %2871 = vmatpush3.bf16.msra.mxu0 %v2868_v18 }
 0x6db   :  { %v2664_v20 = vpop.f32.mrb[4].mxu0 }
 0x6dc   :  { %v703_v21 = vadd.f32 %v2664_v20, %v608_v19  ;;  %v697_v22 = vpop.f32.mrb[5].mxu0 }
 0x6dd   :  { %v698_v23 = vadd.f32 %v697_v22, %v608_v19  ;;  %v3508_v19 = vsub.s32 6, %v3313_v27 }
 0x6de   :  { %v707_v24 = vadd.f32 %v703_v21, %v3334_v41 }
 0x6df   :  { %v706_v25 = vadd.f32 %v698_v23, %v3330_v39  ;;  %v3426_v39 = vld [vmem:[%s3901_s2 + $0x8] sm:$0xff]  ;;  %v749_v20 = vrot.slane %v3321_v30, %v3508_v19 }
 0x6e0   :  { %v711_v26 = vsel %vm64_vm0, %v707_v24, 0.0  ;;  %v2848_v45 = vpack.c.bf16 %v3431_v44, %v3426_v39 }
 0x6e1   :  { %712 = vadd.xlane.f32.xlu1 %v711_v26  ;;  %v708_v28 = vsel %vm64_vm0, %v706_v25, 0.0 }
 0x6e2   :  { %709 = vadd.xlane.f32.xlu0 %v708_v28  ;;  %2849 = vmatprep.subr.bf16.mxu1 %v2848_v45 }
 0x6e3   :  { %2851 = vmatpush3.bf16.msra.mxu1 %v2848_v45 }
 0x6e4   :  { %2853 = vmatprep.subr.bf16.mxu1 %v2852_v49 }
 0x6e7   :  { %2855 = vmatpush3.bf16.msra.mxu1 %v2852_v49 }
 0x76e   :  { %v713_v32 = vpop.xlane.xlu1 %712 }
 0x76f   :  { %v715_v33 = vmul.f32 0.03125, %v713_v32  ;;  %v710_v34 = vpop.xlane.xlu0 %709 }
 0x770   :  { %v714_v35 = vmul.f32 0.03125, %v710_v34 }
 0x771   :  { %v717_v36 = vsub.f32 %v707_v24, %v715_v33 }
 0x772   :  { %v716_v37 = vsub.f32 %v706_v25, %v714_v35 }
 0x773   :  { %v719_v43 = vmul.f32 %v717_v36, %v717_v36 }
 0x774   :  { %v718_v38 = vmul.f32 %v716_v37, %v716_v37 }
 0x775   :  { %v723_v41 = vsel %vm64_vm0, %v719_v43, 0.0 }
 0x776   :  { %v720_v40 = vsel %vm64_vm0, %v718_v38, 0.0 }
 0x777   :  { %721 = vadd.xlane.f32.xlu0 %v720_v40 }
 0x77b   :  { %724 = vadd.xlane.f32.xlu0 %v723_v41 }
 0x804   :  { %v722_v50 = vpop.xlane.xlu0 %721 }
 0x805   :  { %v726_v51 = vmul.f32 0.03125, %v722_v50 }
 0x807   :  { %v728_v52 = vadd.f32 1e-12, %v726_v51 }
 0x808   :  { %v725_v53 = vpop.xlane.xlu0 %724 }
 0x809   :  { %3173 = vrsqrt.f32 %v728_v52  ;;  %v727_v54 = vmul.f32 0.03125, %v725_v53  ;;  %v851_v53 = vsub.s32 7, %v3313_v27 }
 0x80b   :  { %v729_v56 = vadd.f32 1e-12, %v727_v54  ;;  %v852_v54 = vrot.slane %v3321_v30, %v851_v53 }
 0x80d   :  { %3175 = vrsqrt.f32 %v729_v56 }
 0x813   :  { %v3174_v59 = vpop.eup %3173 }
 0x814   :  { %v732_v62 = vmul.f32 %v3174_v59, %v716_v37 }
 0x816   :  { %v738_v0 = vmul.f32 %v737_v58, %v732_v62 }
 0x817   :  { %v3176_v1 = vpop.eup %3175 }
 0x818   :  { %v733_v2 = vmul.f32 %v3176_v1, %v717_v36  ;;  %v744_v3 = vadd.f32 %v743_v63, %v738_v0 }
 0x81a   :  { %v739_v4 = vmul.f32 %v737_v58, %v733_v2  ;;  %2673 = vmatprep.mubr.msk.f32.mxu1 %vm64_vm0, %v744_v3 }
 0x81c   :  { %v745_v5 = vadd.f32 %v743_v63, %v739_v4 }
 0x81e   :  { %2674 = vmatmul.mubr.msk.f32.vlgmr.msra.gmra.mrb[6].mxu1 %vm64_vm0, %v745_v5 }
 0x8f1   :  { %v2675_v21 = vpop.f32.mrb[6].mxu1 }
 0x8f2   :  { %v828_v22 = vadd.f32 %v2675_v21, %v749_v20  ;;  %v822_v23 = vpop.f32.mrb[7].mxu1 }
 0x8f3   :  { %v823_v24 = vadd.f32 %v822_v23, %v749_v20 }
 0x8f4   :  { %v834_v25 = vmul.f32 0.044715, %v828_v22  ;;  %v832_v50 = vmul.f32 0.5, %v828_v22 }
 0x8f5   :  { %v833_v26 = vmul.f32 0.044715, %v823_v24  ;;  %v831_v45 = vmul.f32 0.5, %v823_v24 }
 0x8f6   :  { %v836_v28 = vmul.f32 %v834_v25, %v828_v22  ;;  %v3537_v25 = vld [vmem:[%s3901_s2 + $0x10] sm:$0xff] }
 0x8f7   :  { %v835_v32 = vmul.f32 %v833_v26, %v823_v24 }
 0x8f8   :  { %v838_v33 = vmul.f32 %v836_v28, %v828_v22  ;;  %v3545_v28 = vld [vmem:[%s3901_s2 + $0xa0] sm:$0xff] }
 0x8f9   :  { %v837_v34 = vmul.f32 %v835_v32, %v823_v24  ;;  %v3048_v32 = vpack.i.bf16 %v3545_v28, %v3443_v47 }
 0x8fa   :  { %v840_v35 = vadd.f32 %v838_v33, %v828_v22 }
 0x8fb   :  { %v839_v36 = vadd.f32 %v837_v34, %v823_v24  ;;  %v3532_v24 = vld [vmem:[%s3901_s2 + $0x70] sm:$0xff] }
 0x8fc   :  { %v842_v37 = vmul.f32 0.7978846, %v840_v35  ;;  %v3043_v26 = vpack.i.bf16 %v3532_v24, %v3438_v46 }
 0x8fd   :  { %v841_v38 = vmul.f32 0.7978846, %v839_v36 }
 0x8fe   :  { %3177 = vtanh.f32 %v842_v37 }
 0x8ff   :  { %3179 = vtanh.f32 %v841_v38 }
 0x908   :  { %v3178_v40 = vpop.eup %3177 }
 0x909   :  { %v3180_v43 = vpop.eup %3179  ;;  %v846_v41 = vadd.f32 1.0, %v3178_v40 }
 0x90a   :  { %v845_v49 = vadd.f32 1.0, %v3180_v43 }
 0x90b   :  { %v848_v52 = vmul.f32 %v846_v41, %v832_v50 }
 0x90c   :  { %v847_v51 = vmul.f32 %v845_v49, %v831_v45 }
 0x90e   :  { %2692 = vmatprep.mubr.msk.f32.mxu0 %vm853_vm4, %v847_v51 }
 0x90f   :  { %2693 = vmatmul.mubr.msk.f32.vlgmr.msra.gmra.mrb[6].mxu0 %vm853_vm4, %v848_v52 }
 0x9e2   :  { %v2694_v56 = vpop.f32.mrb[6].mxu0 }
 0x9e3   :  { %v932_v58 = vadd.f32 %v2694_v56, %v852_v54  ;;  %v926_v59 = vpop.f32.mrb[7].mxu0 }
 0x9e4   :  { %v927_v62 = vadd.f32 %v926_v59, %v852_v54 }
 0x9e5   :  { %v936_v63 = vadd.f32 %v932_v58, %v745_v5  ;;  %v3559_v58 = vld [vmem:[%s3902_s6 + $0x10] sm:$0xff] }
 0x9e6   :  { %v935_v0 = vadd.f32 %v927_v62, %v744_v3  ;;  %v3525_v3 = vld [vmem:[%s3901_s2 + $0x40] sm:$0xff] }
 0x9e7   :  { %v940_v1 = vsel %vm64_vm0, %v936_v63, 0.0  ;;  %v3038_v23 = vpack.i.bf16 %v3525_v3, %v3431_v44  ;;  %v3033_v44 = vpack.i.bf16 %v3537_v25, %v3426_v39 }
 0x9e8   :  { %941 = vadd.xlane.f32.xlu1 %v940_v1  ;;  %v937_v2 = vsel %vm64_vm0, %v935_v0, 0.0 }
 0x9e9   :  { %938 = vadd.xlane.f32.xlu0 %v937_v2 }
 0xa75   :  { %v942_v4 = vpop.xlane.xlu1 %941 }
 0xa76   :  { %v944_v8 = vmul.f32 0.03125, %v942_v4  ;;  %v939_v9 = vpop.xlane.xlu0 %938 }
 0xa77   :  { %v943_v11 = vmul.f32 0.03125, %v939_v9 }
 0xa78   :  { %v946_v18 = vsub.f32 %v936_v63, %v944_v8 }
 0xa79   :  { %v945_v20 = vsub.f32 %v935_v0, %v943_v11  ;;  %v966_v0 = vrot.slane %v3559_v58, %v3316_v29 }
 0xa7a   :  { %v948_v21 = vmul.f32 %v946_v18, %v946_v18 }
 0xa7b   :  { %v947_v30 = vmul.f32 %v945_v20, %v945_v20 }
 0xa7c   :  { %v952_v22 = vsel %vm64_vm0, %v948_v21, 0.0 }
 0xa7d   :  { %953 = vadd.xlane.f32.xlu1 %v952_v22  ;;  %v949_v5 = vsel %vm64_vm0, %v947_v30, 0.0  ;;  %v972_v22 = vrot.slane %v3559_v58, %v3324_v31 }
 0xa7e   :  { %950 = vadd.xlane.f32.xlu0 %v949_v5 }
 0xa8e   :  { %3039 = vrot.lane.b32.xlu1 %v3038_v23, %s3231_s21 }
 0xa92   :  { %3044 = vrot.lane.b32.xlu1 %v3043_v26, %s3231_s21 }
 0xa94   :  { %3034 = vrot.lane.b32.xlu0 %v3033_v44, %s3231_s21 }
 0xa96   :  { %3049 = vrot.lane.b32.xlu1 %v3048_v32, %s3231_s21 }
 0xb0a   :  { %v954_v33 = vpop.xlane.xlu1 %953 }
 0xb0b   :  { %v956_v34 = vmul.f32 0.03125, %v954_v33  ;;  %v951_v46 = vpop.xlane.xlu0 %950 }
 0xb0c   :  { %v955_v35 = vmul.f32 0.03125, %v951_v46 }
 0xb0d   :  { %v958_v36 = vadd.f32 1e-12, %v956_v34 }
 0xb0e   :  { %v957_v37 = vadd.f32 1e-12, %v955_v35  ;;  %v3040_v38 = vpop.permute.xlu1 %3039 }
 0xb0f   :  { %3181 = vrsqrt.f32 %v958_v36  ;;  %v3042_v40 = vunpack.i.h.bf16 %v3040_v38  ;;  %v3041_v43 = vunpack.i.l.bf16 %v3040_v38  ;;  %v3035_v39 = vpop.permute.xlu0 %3034 }
 0xb10   :  { %3183 = vrsqrt.f32 %v957_v37  ;;  %v3037_v41 = vunpack.i.h.bf16 %v3035_v39  ;;  %v3036_v45 = vunpack.i.l.bf16 %v3035_v39 }
 0xb11   :  { %v1004_v47 = vsel %vm853_vm4, %v3041_v43, %v3042_v40 }
 0xb12   :  { %v2908_v49 = vpack.c.bf16 %v3042_v40, %v3037_v41  ;;  %v3045_v50 = vpop.permute.xlu1 %3044  ;;  %v1003_v51 = vsel %vm853_vm4, %v3036_v45, %v3037_v41 }
 0xb13   :  { %v2872_v52 = vpack.c.bf16 %v1004_v47, %v1003_v51  ;;  %v3047_v54 = vunpack.i.h.bf16 %v3045_v50  ;;  %v3046_v56 = vunpack.i.l.bf16 %v3045_v50 }
 0xb15   :  { %2873 = vmatprep.subr.bf16.mxu1 %v2872_v52  ;;  %v1005_v4 = vsel %vm853_vm4, %v3046_v56, %v3047_v54 }
 0xb16   :  { %v3050_v59 = vpop.permute.xlu1 %3049  ;;  %2875 = vmatpush3.bf16.msra.mxu1 %v2872_v52 }
 0xb17   :  { %v3052_v62 = vunpack.i.h.bf16 %v3050_v59  ;;  %v3051_v63 = vunpack.i.l.bf16 %v3050_v59 }
 0xb19   :  { %v3182_v1 = vpop.eup %3181  ;;  %v2912_v2 = vpack.c.bf16 %v3052_v62, %v3047_v54  ;;  %v1006_v8 = vsel %vm853_vm4, %v3051_v63, %v3052_v62 }
 0xb1a   :  { %v3184_v9 = vpop.eup %3183  ;;  %v962_v11 = vmul.f32 %v3182_v1, %v946_v18  ;;  %v2876_v21 = vpack.c.bf16 %v1006_v8, %v1005_v4  ;;  %v978_v18 = vrot.slane %v3559_v58, %v3339_v42 }
 0xb1b   :  { %v961_v30 = vmul.f32 %v3184_v9, %v945_v20 }
 0xb1c   :  { %2877 = vmatprep.subr.bf16.mxu1 %v2876_v21  ;;  %v968_v5 = vmul.f32 %v966_v0, %v962_v11 }
 0xb1d   :  { %2879 = vmatpush3.bf16.msra.mxu1 %v2876_v21  ;;  %v967_v23 = vmul.f32 %v966_v0, %v961_v30 }
 0xb1e   :  { %v3569_v44 = vadd.f32 %v972_v22, %v968_v5 }
 0xb1f   :  { %v3567_v26 = vadd.f32 %v972_v22, %v967_v23 }
 0xb21   :  { %2703 = vmatprep.mubr.msk.f32.mxu1 %vm64_vm0, %v3567_v26 }
 0xb22   :  { %2704 = vmatmul.mubr.msk.f32.vlgmr.msra.gmra.mrb[8].mxu1 %vm64_vm0, %v3569_v44 }
 0xbf5   :  { %v2705_v20 = vpop.f32.mrb[8].mxu1 }
 0xbf6   :  { %v1089_v32 = vadd.f32 %v2705_v20, %v978_v18  ;;  %v1083_v33 = vpop.f32.mrb[9].mxu1 }
 0xbf7   :  { %v1084_v34 = vadd.f32 %v1083_v33, %v978_v18 }
 0xbf9   :  { %2710 = vmatprep.mubr.msk.f32.mxu1 %vm197_vm1, %v1084_v34  ;;  %v3578_v46 = vpack.i.bf16 %v1089_v32, %v1084_v34 }
 0xbfb   :  { %3059 = vrot.lane.b32.xlu1 %v3578_v46, %s3227_s14  ;;  %3054 = vrot.lane.b32.xlu0 %v3578_v46, %s3228_s15 }
 0xbff   :  { %1294 = vrot.lane.b32.xlu1 %v1089_v32, %s3229_s16  ;;  %1292 = vrot.lane.b32.xlu0 %v1084_v34, %s3229_s16 }
 0xc6d   :  { %v3060_v35 = vpop.permute.xlu1 %3059  ;;  %v3055_v36 = vpop.permute.xlu0 %3054 }
 0xc6e   :  { %v3062_v37 = vunpack.i.h.bf16 %v3060_v35  ;;  %v3061_v38 = vunpack.i.l.bf16 %v3060_v35  ;;  %v3057_v40 = vunpack.i.h.bf16 %v3055_v36  ;;  %v3056_v43 = vunpack.i.l.bf16 %v3055_v36 }
 0xc70   :  { %v2880_v39 = vpack.c.bf16 %v3057_v40, %v3056_v43  ;;  %v2890_v41 = vpack.c.bf16 %v3062_v37, %v3061_v38 }
 0xc71   :  { %v1293_v45 = vpop.permute.xlu0 %1292  ;;  %v1295_v47 = vpop.permute.xlu1 %1294 }
 0xc72   :  { %2882 = vmatprep.subr.msk.bf16.mxu1 %vm3354_vm2, %v2880_v39 }
 0xc73   :  { %2885 = vmatpush3.bf16.xpose.msk.msra.mxu1 %vm3354_vm2, %v2880_v39 }
 0xc74   :  { %2892 = vmatprep.subr.msk.bf16.mxu1 %vm3354_vm2, %v2890_v41 }
 0xc7a   :  { %2711 = vmatmul.mubr.msk.f32.vlgmr.msra.gmra.mrb[10].mxu1 %vm197_vm1, %v1089_v32 }
 0xc7b   :  { %2895 = vmatpush3.bf16.xpose.msk.msra.mxu1 %vm3354_vm2, %v2890_v41  ;;  %2724 = vmatprep.mubr.msk.f32.mxu1 %vm197_vm1, %v1293_v45 }
 0xc7c   :  { %2909 = vmatprep.subr.bf16.mxu1 %v2908_v49 }
 0xc82   :  { %2725 = vmatmul.mubr.msk.f32.vlgmr.msra.gmra.mrb[12].mxu1 %vm197_vm1, %v1295_v47 }
 0xc83   :  { %2911 = vmatpush3.bf16.msra.mxu1 %v2908_v49 }
 0xc84   :  { %2913 = vmatprep.subr.bf16.mxu1 %v2912_v2 }
 0xc87   :  { %2915 = vmatpush3.bf16.msra.mxu1 %v2912_v2 }
 0xd4d   :  { %v2712_v50 = vpop.f32.mrb[10].mxu1 }
 0xd4e   :  { %v1178_v51 = vadd.f32 %v2712_v50, %v3372_v60  ;;  %v1172_v52 = vpop.f32.mrb[11].mxu1 }
 0xd4f   :  { %v1173_v54 = vadd.f32 %v1172_v52, %v3377_v61 }
 0xd50   :  { %v1184_v56 = vsel %vm197_vm1, %v1178_v51, -inf }
 0xd51   :  { %1185 = vmax.xlane.f32.xlu1 %v1184_v56  ;;  %v1181_v55 = vsel %vm197_vm1, %v1173_v54, -inf }
 0xd52   :  { %1182 = vmax.xlane.f32.xlu0 %v1181_v55 }
 0xd55   :  { %v2726_v59 = vpop.f32.mrb[12].mxu1 }
 0xd56   :  { %v1374_v62 = vpop.f32.mrb[13].mxu1  ;;  %v1380_v49 = vadd.f32 %v2726_v59, %v3372_v60 }
 0xd57   :  { %v1375_v63 = vadd.f32 %v1374_v62, %v3377_v61 }
 0xd58   :  { %v1386_v1 = vsel %vm197_vm1, %v1380_v49, -inf }
 0xd59   :  { %v1383_v0 = vsel %vm197_vm1, %v1375_v63, -inf }
 0xd5a   :  { %1384 = vmax.xlane.f32.xlu0 %v1383_v0 }
 0xd5e   :  { %1387 = vmax.xlane.f32.xlu0 %v1386_v1 }
 0xdde   :  { %v1186_v2 = vpop.xlane.xlu1 %1185 }
 0xddf   :  { %v1188_v4 = vsub.f32 %v1178_v51, %v1186_v2  ;;  %v1183_v8 = vpop.xlane.xlu0 %1182  ;;  %v3073_v2 = vpack.i.bf16 %v3525_v3, %v3537_v25  ;;  %v3078_v3 = vpack.i.bf16 %v3545_v28, %v3532_v24  ;;  %v1507_v24 = vrot.slane %v3559_v58, %v3413_v16 }
 0xde0   :  { %v1187_v9 = vsub.f32 %v1173_v54, %v1183_v8 }
 0xde1   :  { %v1191_v11 = vmul.f32 1.442695, %v1188_v4 }
 0xde2   :  { %v1189_v21 = vmul.f32 1.442695, %v1187_v9 }
 0xde3   :  { %3185 = vpow2.f32 %v1191_v11 }
 0xde4   :  { %3187 = vpow2.f32 %v1189_v21 }
 0xde7   :  { %v1385_v30 = vpop.xlane.xlu0 %1384 }
 0xde8   :  { %v1389_v22 = vsub.f32 %v1375_v63, %v1385_v30 }
 0xdea   :  { %v1391_v5 = vmul.f32 1.442695, %v1389_v22 }
 0xdeb   :  { %v1388_v61 = vpop.xlane.xlu0 %1387 }
 0xdec   :  { %3189 = vpow2.f32 %v1391_v5  ;;  %v1390_v60 = vsub.f32 %v1380_v49, %v1388_v61 }
 0xded   :  { %v3186_v23 = vpop.eup %3185 }
 0xdee   :  { %v3188_v18 = vpop.eup %3187  ;;  %v1393_v20 = vmul.f32 1.442695, %v1390_v60  ;;  %v1196_v32 = vsel %vm197_vm1, %v3186_v23, 0.0 }
 0xdef   :  { %1197 = vadd.xlane.f32.xlu1 %v1196_v32  ;;  %v1193_v33 = vsel %vm197_vm1, %v3188_v18, 0.0 }
 0xdf0   :  { %3191 = vpow2.f32 %v1393_v20  ;;  %1194 = vadd.xlane.f32.xlu0 %v1193_v33 }
 0xdf6   :  { %v3190_v34 = vpop.eup %3189 }
 0xdf7   :  { %v1395_v35 = vsel %vm197_vm1, %v3190_v34, 0.0 }
 0xdf8   :  { %1396 = vadd.xlane.f32.xlu0 %v1395_v35 }
 0xdfa   :  { %v3192_v36 = vpop.eup %3191 }
 0xdfb   :  { %v1398_v37 = vsel %vm197_vm1, %v3192_v36, 0.0 }
 0xdfc   :  { %1399 = vadd.xlane.f32.xlu1 %v1398_v37 }
 0xe0d   :  { %3069 = vrot.lane.b32.xlu1 %v3578_v46, %s3230_s1 }
 0xe0e   :  { %3064 = vrot.lane.b32.xlu0 %v3578_v46, %s3231_s21 }
 0xe11   :  { %3074 = vrot.lane.b32.xlu1 %v3073_v2, %s3228_s15 }
 0xe7c   :  { %v1198_v40 = vpop.xlane.xlu1 %1197 }
 0xe7d   :  { %v1195_v38 = vpop.xlane.xlu0 %1194 }
 0xe7e   :  { %3193 = vrcp.f32 %v1195_v38 }
 0xe7f   :  { %3195 = vrcp.f32 %v1198_v40 }
 0xe85   :  { %v1397_v43 = vpop.xlane.xlu0 %1396 }
 0xe86   :  { %3197 = vrcp.f32 %v1397_v43 }
 0xe88   :  { %v3194_v39 = vpop.eup %3193 }
 0xe89   :  { %v1400_v41 = vpop.xlane.xlu1 %1399  ;;  %v3065_v45 = vpop.permute.xlu0 %3064  ;;  %v1201_v47 = vmul.f32 %v3194_v39, %v3188_v18 }
 0xe8a   :  { %3199 = vrcp.f32 %v1400_v41  ;;  %v3067_v50 = vunpack.i.h.bf16 %v3065_v45  ;;  %v3066_v51 = vunpack.i.l.bf16 %v3065_v45  ;;  %v3196_v54 = vpop.eup %3195 }
 0xe8b   :  { %2717 = vmatprep.mubr.msk.f32.mxu0 %vm197_vm1, %v1201_v47  ;;  %v1202_v62 = vmul.f32 %v3196_v54, %v3186_v23 }
 0xe8c   :  { %v2886_v52 = vpack.c.bf16 %v3067_v50, %v3066_v51 }
 0xe8d   :  { %v3070_v56 = vpop.permute.xlu1 %3069 }
 0xe8e   :  { %v3072_v55 = vunpack.i.h.bf16 %v3070_v56  ;;  %v3071_v46 = vunpack.i.l.bf16 %v3070_v56  ;;  %2887 = vmatprep.subr.bf16.mxu0 %v2886_v52 }
 0xe8f   :  { %2889 = vmatpush3.bf16.msra.mxu0 %v2886_v52 }
 0xe90   :  { %v3198_v59 = vpop.eup %3197  ;;  %v2896_v63 = vpack.c.bf16 %v3072_v55, %v3071_v46  ;;  %v3088_v55 = vpack.i.bf16 %v3479_v15, %v3474_v14  ;;  %v3093_v46 = vpack.i.bf16 %v3491_v10, %v3484_v17  ;;  %v1638_v10 = vrot.slane %v3559_v58, %v3451_v57 }
 0xe91   :  { %v1403_v49 = vmul.f32 %v3198_v59, %v3190_v34  ;;  %v3075_v4 = vpop.permute.xlu1 %3074  ;;  %v3098_v59 = vpack.i.bf16 %v3503_v13, %v3498_v12 }
 0xe92   :  { %2718 = vmatmul.mubr.msk.f32.vlgmr.msra.gmra.mrb[8].mxu0 %vm197_vm1, %v1202_v62  ;;  %2897 = vmatprep.subr.bf16.mxu0 %v2896_v63  ;;  %v3077_v8 = vunpack.i.h.bf16 %v3075_v4  ;;  %v3076_v9 = vunpack.i.l.bf16 %v3075_v4 }
 0xe93   :  { %2899 = vmatpush3.bf16.msra.mxu0 %v2896_v63  ;;  %2731 = vmatprep.mubr.msk.f32.mxu0 %vm197_vm1, %v1403_v49  ;;  %v1632_v49 = vrot.slane %v3559_v58, %v3448_v48 }
 0xe94   :  { %v3200_v0 = vpop.eup %3199  ;;  %v2900_v11 = vpack.c.bf16 %v3077_v8, %v3076_v9 }
 0xe95   :  { %v1404_v1 = vmul.f32 %v3200_v0, %v3192_v36 }
 0xe96   :  { %2901 = vmatprep.subr.bf16.mxu0 %v2900_v11 }
 0xe97   :  { %2732 = vmatmul.mubr.msk.f32.vlgmr.msra.gmra.mrb[10].mxu0 %vm197_vm1, %v1404_v1 }
 0xe98   :  { %2903 = vmatpush3.bf16.msra.mxu0 %v2900_v11 }
 0xf65   :  { %v2719_v21 = vpop.f32.mrb[8].mxu0 }
 0xf66   :  { %1291 = vst.msk [vmem:[#allocation2 + $0x8] sm:$0xff] %vm197_vm1, %v2719_v21  ;;  %v1281_v30 = vpop.f32.mrb[9].mxu0 }
 0xf67   :  { %1290 = vst.msk [vmem:[#allocation2] sm:$0xff] %vm197_vm1, %v1281_v30 }
 0xf6a   :  { %v2733_v22 = vpop.f32.mrb[10].mxu0 }
 0xf6b   :  { %1496 = vrot.lane.b32.xlu0 %v2733_v22, %s3233_s23  ;;  %v1483_v5 = vpop.f32.mrb[11].mxu0 }
 0xf6c   :  { %1494 = vrot.lane.b32.xlu1 %v1483_v5, %s3233_s23 }
 0xf70   :  { %3079 = vrot.lane.b32.xlu1 %v3078_v3, %s3228_s15 }
 0xfdd   :  { %v1497_v25 = vpop.permute.xlu0 %1496 }
 0xfde   :  { %1501 = vst.msk [vmem:[#allocation2 + $0x8] sm:$0xff] %vm600_vm3, %v1497_v25  ;;  %v1495_v61 = vpop.permute.xlu1 %1494 }
 0xfdf   :  { %1500 = vst.msk [vmem:[#allocation2] sm:$0xff] %vm600_vm3, %v1495_v61 }
 0xfe2   :  { %v3080_v60 = vpop.permute.xlu1 %3079 }
 0xfe3   :  { %v3082_v23 = vunpack.i.h.bf16 %v3080_v60  ;;  %v3081_v18 = vunpack.i.l.bf16 %v3080_v60 }
 0xfe5   :  { %v2904_v20 = vpack.c.bf16 %v3082_v23, %v3081_v18  ;;  %v1503_v33 = vld [vmem:[#allocation2 + $0x8] sm:$0xff] }
 0xfe6   :  { %v1502_v32 = vld [vmem:[#allocation2] sm:$0xff] }
 0xfe7   :  { %2905 = vmatprep.subr.bf16.mxu0 %v2904_v20  ;;  %2742 = vmatprep.mubr.msk.f32.mxu0 %vm64_vm0, %v1502_v32 }
 0xfe8   :  { %2907 = vmatpush3.bf16.msra.mxu0 %v2904_v20 }
 0xfeb   :  { %2743 = vmatmul.mubr.msk.f32.vlgmr.msra.gmra.mrb[12].mxu0 %vm64_vm0, %v1503_v33 }
0x10be   :  { %v2744_v28 = vpop.f32.mrb[12].mxu0 }
0x10bf   :  { %v1598_v34 = vadd.f32 %v2744_v28, %v1507_v24  ;;  %v1592_v35 = vpop.f32.mrb[13].mxu0  ;;  %v1644_v28 = vrot.slane %v3559_v58, %v3508_v19 }
0x10c0   :  { %v1593_v36 = vadd.f32 %v1592_v35, %v1507_v24 }
0x10c1   :  { %v1602_v37 = vadd.f32 %v1598_v34, %v3569_v44 }
0x10c2   :  { %v1601_v38 = vadd.f32 %v1593_v36, %v3567_v26  ;;  %v3083_v26 = vpack.i.bf16 %v3467_v7, %v3462_v6 }
0x10c3   :  { %v1606_v40 = vsel %vm64_vm0, %v1602_v37, 0.0 }
0x10c4   :  { %1607 = vadd.xlane.f32.xlu1 %v1606_v40  ;;  %v1603_v43 = vsel %vm64_vm0, %v1601_v38, 0.0 }
0x10c5   :  { %1604 = vadd.xlane.f32.xlu0 %v1603_v43 }
0x10d5   :  { %3089 = vrot.lane.b32.xlu1 %v3088_v55, %s3228_s15 }
0x10d9   :  { %3094 = vrot.lane.b32.xlu1 %v3093_v46, %s3228_s15 }
0x10dd   :  { %3099 = vrot.lane.b32.xlu1 %v3098_v59, %s3228_s15 }
0x1151   :  { %v1608_v39 = vpop.xlane.xlu1 %1607 }
0x1152   :  { %v1610_v41 = vmul.f32 0.03125, %v1608_v39  ;;  %v1605_v45 = vpop.xlane.xlu0 %1604 }
0x1153   :  { %v1609_v47 = vmul.f32 0.03125, %v1605_v45 }
0x1154   :  { %v1612_v50 = vsub.f32 %v1602_v37, %v1610_v41 }
0x1155   :  { %v1611_v51 = vsub.f32 %v1601_v38, %v1609_v47  ;;  %v3090_v22 = vpop.permute.xlu1 %3089 }
0x1156   :  { %v1614_v56 = vmul.f32 %v1612_v50, %v1612_v50  ;;  %v3092_v5 = vunpack.i.h.bf16 %v3090_v22  ;;  %v3091_v3 = vunpack.i.l.bf16 %v3090_v22  ;;  %v3234_v22 = vmov 0.0|0.0  }
0x1157   :  { %v1613_v52 = vmul.f32 %v1611_v51, %v1611_v51  ;;  %2932 = vmatprep.subr.bf16.mxu1 %v3234_v22 }
0x1158   :  { %v1618_v44 = vsel %vm64_vm0, %v1614_v56, 0.0  ;;  %v2920_v25 = vpack.c.bf16 %v3092_v5, %v3091_v3  ;;  %v45_v5 = vld [vmem:[%s3901_s2 + $0x78] sm:$0xff]  ;;  %v51_v3 = vld [vmem:[%s3901_s2 + $0xa8] sm:$0xff] }
0x1159   :  { %v1615_v54 = vsel %vm64_vm0, %v1613_v52, 0.0  ;;  %v3095_v61 = vpop.permute.xlu1 %3094 }
0x115a   :  { %1616 = vadd.xlane.f32.xlu0 %v1615_v54  ;;  %v3097_v60 = vunpack.i.h.bf16 %v3095_v61  ;;  %v3096_v23 = vunpack.i.l.bf16 %v3095_v61  ;;  %v3236_v61 = vmov 0.0  }
0x115c   :  { %v2924_v18 = vpack.c.bf16 %v3097_v60, %v3096_v23  ;;  %v40_v60 = vld [vmem:[%s3901_s2 + $0x50] sm:$0xff]  ;;  %v41_v23 = vld [vmem:[%s3901_s2 + $0x58] sm:$0xff] }
0x115d   :  { %v3100_v20 = vpop.permute.xlu1 %3099 }
0x115e   :  { %1619 = vadd.xlane.f32.xlu0 %v1618_v44  ;;  %v3102_v32 = vunpack.i.h.bf16 %v3100_v20  ;;  %v3101_v33 = vunpack.i.l.bf16 %v3100_v20  ;;  %v3108_v20 = vpack.i.bf16 %v41_v23, %v40_v60 }
0x1160   :  { %v2928_v24 = vpack.c.bf16 %v3102_v32, %v3101_v33  ;;  %v35_v32 = vld [vmem:[%s3901_s2 + $0x28] sm:$0xff] }
0x1174   :  { %3084 = vrot.lane.b32.xlu0 %v3083_v26, %s3228_s15 }
0x11e7   :  { %v1617_v62 = vpop.xlane.xlu0 %1616 }
0x11e8   :  { %v1621_v63 = vmul.f32 0.03125, %v1617_v62 }
0x11ea   :  { %v1623_v6 = vadd.f32 1e-12, %v1621_v63  ;;  %v1751_v63 = vrot.slane %v3559_v58, %v851_v53 }
0x11eb   :  { %v1620_v7 = vpop.xlane.xlu0 %1619 }
0x11ec   :  { %3201 = vrsqrt.f32 %v1623_v6  ;;  %v1622_v14 = vmul.f32 0.03125, %v1620_v7 }
0x11ee   :  { %v1624_v15 = vadd.f32 1e-12, %v1622_v14 }
0x11ef   :  { %v3085_v9 = vpop.permute.xlu0 %3084 }
0x11f0   :  { %3203 = vrsqrt.f32 %v1624_v15  ;;  %v3087_v11 = vunpack.i.h.bf16 %v3085_v9  ;;  %v3086_v21 = vunpack.i.l.bf16 %v3085_v9 }
0x11f2   :  { %v2916_v30 = vpack.c.bf16 %v3087_v11, %v3086_v21  ;;  %v33_v11 = vld [vmem:[%s3901_s2 + $0x18] sm:$0xff]  ;;  %v39_v21 = vld [vmem:[%s3901_s2 + $0x48] sm:$0xff] }
0x11f4   :  { %2917 = vmatprep.subr.bf16.mxu0 %v2916_v30 }
0x11f5   :  { %2919 = vmatpush3.bf16.msra.mxu0 %v2916_v30  ;;  %v2933_v30 = vpack.c.bf16 %v39_v21, %v33_v11 }
0x11f6   :  { %v3202_v0 = vpop.eup %3201  ;;  %2921 = vmatprep.subr.bf16.mxu0 %v2920_v25 }
0x11f7   :  { %v1627_v17 = vmul.f32 %v3202_v0, %v1611_v51 }
0x11f9   :  { %v1633_v1 = vmul.f32 %v1632_v49, %v1627_v17  ;;  %2923 = vmatpush3.bf16.msra.mxu0 %v2920_v25  ;;  %v2936_v25 = vpack.c.bf16 %v51_v3, %v45_v5 }
0x11fa   :  { %v3204_v12 = vpop.eup %3203  ;;  %2925 = vmatprep.subr.bf16.mxu0 %v2924_v18 }
0x11fb   :  { %v1628_v13 = vmul.f32 %v3204_v12, %v1612_v50  ;;  %v1639_v2 = vadd.f32 %v1638_v10, %v1633_v1 }
0x11fd   :  { %v1634_v4 = vmul.f32 %v1632_v49, %v1628_v13  ;;  %2753 = vmatprep.mubr.msk.f32.mxu1 %vm64_vm0, %v1639_v2  ;;  %2927 = vmatpush3.bf16.msra.mxu0 %v2924_v18  ;;  %v34_v18 = vld [vmem:[%s3901_s2 + $0x20] sm:$0xff] }
0x11fe   :  { %2929 = vmatprep.subr.bf16.mxu0 %v2928_v24  ;;  %v3103_v33 = vpack.i.bf16 %v35_v32, %v34_v18 }
0x11ff   :  { %v1640_v8 = vadd.f32 %v1638_v10, %v1634_v4 }
0x1201   :  { %2754 = vmatmul.mubr.msk.f32.vlgmr.msra.gmra.mrb[14].mxu1 %vm64_vm0, %v1640_v8  ;;  %2931 = vmatpush3.bf16.msra.mxu0 %v2928_v24  ;;  %v52_v24 = vld [vmem:[%s3901_s2 + $0xb0] sm:$0xff] }
0x1202   :  { %2934 = vmatpush3.bf16.msra.mxu1 %v2933_v30  ;;  %2783 = vmatprep.mubr.msk.f32.mxu1 %vm3235_vm5, %v3236_v61 }
0x1203   :  { %2935 = vmatprep.subr.bf16.mxu1 %v3234_v22 }
0x1206   :  { %2937 = vmatpush3.bf16.msra.mxu1 %v2936_v25 }
0x12d4   :  { %v2755_v34 = vpop.f32.mrb[14].mxu1 }
0x12d5   :  { %v1727_v35 = vadd.f32 %v2755_v34, %v1644_v28  ;;  %v1721_v36 = vpop.f32.mrb[15].mxu1  ;;  %v3113_v34 = vpack.i.bf16 %v39_v21, %v33_v11 }
0x12d6   :  { %v1722_v37 = vadd.f32 %v1721_v36, %v1644_v28  ;;  %v53_v28 = vld [vmem:[%s3901_s2 + $0xb8] sm:$0xff]  ;;  %v47_v36 = vld [vmem:[%s3901_s2 + $0x88] sm:$0xff] }
0x12d7   :  { %v1733_v38 = vmul.f32 0.044715, %v1727_v35  ;;  %v1731_v46 = vmul.f32 0.5, %v1727_v35 }
0x12d8   :  { %v1732_v40 = vmul.f32 0.044715, %v1722_v37  ;;  %v1730_v26 = vmul.f32 0.5, %v1722_v37 }
0x12d9   :  { %v1735_v43 = vmul.f32 %v1733_v38, %v1727_v35 }
0x12da   :  { %v1734_v39 = vmul.f32 %v1732_v40, %v1722_v37  ;;  %v3128_v40 = vpack.i.bf16 %v51_v3, %v45_v5 }
0x12db   :  { %v1737_v41 = vmul.f32 %v1735_v43, %v1727_v35 }
0x12dc   :  { %v1736_v45 = vmul.f32 %v1734_v39, %v1722_v37 }
0x12dd   :  { %v1739_v47 = vadd.f32 %v1737_v41, %v1727_v35  ;;  %v46_v35 = vld [vmem:[%s3901_s2 + $0x80] sm:$0xff] }
0x12de   :  { %v1738_v50 = vadd.f32 %v1736_v45, %v1722_v37  ;;  %v3123_v37 = vpack.i.bf16 %v53_v28, %v52_v24  ;;  %v3118_v38 = vpack.i.bf16 %v47_v36, %v46_v35  ;;  %v2140_v24 = vld [vmem:[%s3905_s4 + $0x80] sm:$0xff]  ;;  %v2141_v28 = vld [vmem:[%s3905_s4 + $0x88] sm:$0xff] }
0x12df   :  { %v1741_v51 = vmul.f32 0.7978846, %v1739_v47  ;;  %v2946_v35 = vpack.c.bf16 %v2141_v28, %v2140_v24  ;;  %v2125_v36 = vld [vmem:[%s3905_s4 + $0x8] sm:$0xff]  ;;  %v3222_v24 = vld [vmem:[%s3904_s3 + $0x18] sm:$0xff] }
0x12e0   :  { %v1740_v52 = vmul.f32 0.7978846, %v1738_v50 }
0x12e1   :  { %3205 = vtanh.f32 %v1741_v51  ;;  %v3721_v51 = vld [vmem:[%s3902_s6 + $0x20] sm:$0xff]  ;;  %2947 = vmatprep.subr.bf16.mxu0 %v2946_v35  ;;  %v3224_v35 = vld [vmem:[%s3904_s3 + $0x28] sm:$0xff] }
0x12e2   :  { %3207 = vtanh.f32 %v1740_v52  ;;  %v1896_v52 = vrot.slane %v3721_v51, %v3316_v29 }
0x12eb   :  { %v3206_v54 = vpop.eup %3205 }
0x12ec   :  { %v3208_v56 = vpop.eup %3207  ;;  %v1745_v44 = vadd.f32 1.0, %v3206_v54 }
0x12ed   :  { %v1744_v55 = vadd.f32 1.0, %v3208_v56 }
0x12ee   :  { %v1747_v62 = vmul.f32 %v1745_v44, %v1731_v46  ;;  %v1902_v44 = vrot.slane %v3721_v51, %v3324_v31 }
0x12ef   :  { %v1746_v59 = vmul.f32 %v1744_v55, %v1730_v26 }
0x12f1   :  { %2772 = vmatprep.mubr.msk.f32.mxu0 %vm853_vm4, %v1746_v59 }
0x12f2   :  { %2773 = vmatmul.mubr.msk.f32.vlgmr.msra.gmra.mrb[14].mxu0 %vm853_vm4, %v1747_v62 }
0x13c5   :  { %v2774_v6 = vpop.f32.mrb[14].mxu0 }
0x13c6   :  { %v1862_v7 = vadd.f32 %v2774_v6, %v1751_v63  ;;  %v1856_v14 = vpop.f32.mrb[15].mxu0 }
0x13c7   :  { %v1857_v15 = vadd.f32 %v1856_v14, %v1751_v63 }
0x13c8   :  { %v1866_v49 = vadd.f32 %v1862_v7, %v1640_v8 }
0x13c9   :  { %v1865_v0 = vadd.f32 %v1857_v15, %v1639_v2 }
0x13ca   :  { %v1870_v17 = vsel %vm64_vm0, %v1866_v49, 0.0 }
0x13cb   :  { %1871 = vadd.xlane.f32.xlu0 %v1870_v17  ;;  %v1867_v10 = vsel %vm64_vm0, %v1865_v0, 0.0 }
0x13cc   :  { %1868 = vadd.xlane.f32.xlu1 %v1867_v10 }
0x13dd   :  { %3109 = vrot.lane.b32.xlu1 %v3108_v20, %s3228_s15 }
0x13e1   :  { %3114 = vrot.lane.b32.xlu1 %v3113_v34, %s3228_s15  ;;  %v2124_v34 = vld [vmem:[%s3905_s4] sm:$0xff] }
0x13e5   :  { %3119 = vrot.lane.b32.xlu1 %v3118_v38, %s3228_s15  ;;  %v2143_v38 = vld [vmem:[%s3905_s4 + $0x98] sm:$0xff] }
0x13e9   :  { %3129 = vrot.lane.b32.xlu1 %v3128_v40, %s3228_s15  ;;  %v2948_v40 = vpack.c.bf16 %v2125_v36, %v2124_v34  ;;  %v3223_v34 = vld [vmem:[%s3904_s3 + $0x20] sm:$0xff] }
0x13ea   :  { %v3143_v36 = vpack.i.bf16 %v3224_v35, %v3223_v34 }
0x13eb   :  { %2949 = vmatpush3.bf16.msra.mxu0 %v2948_v40 }
0x1458   :  { %v1872_v1 = vpop.xlane.xlu0 %1871 }
0x1459   :  { %v1874_v12 = vmul.f32 0.03125, %v1872_v1  ;;  %v1869_v13 = vpop.xlane.xlu1 %1868 }
0x145a   :  { %v1873_v4 = vmul.f32 0.03125, %v1869_v13 }
0x145b   :  { %v1876_v9 = vsub.f32 %v1866_v49, %v1874_v12 }
0x145c   :  { %v3666_v27 = vsub.f32 %v1865_v0, %v1873_v4 }
0x145d   :  { %v1878_v53 = vmul.f32 %v1876_v9, %v1876_v9  ;;  %v3110_v26 = vpop.permute.xlu1 %3109 }
0x145e   :  { %v1877_v8 = vmul.f32 %v3666_v27, %v3666_v27  ;;  %v3112_v55 = vunpack.i.h.bf16 %v3110_v26  ;;  %v3111_v46 = vunpack.i.l.bf16 %v3110_v26  ;;  %v2147_v26 = vld [vmem:[%s3905_s4 + $0xb8] sm:$0xff] }
0x145f   :  { %v1882_v58 = vsel %vm64_vm0, %v1878_v53, 0.0 }
0x1460   :  { %1883 = vadd.xlane.f32.xlu0 %v1882_v58  ;;  %v1879_v2 = vsel %vm64_vm0, %v1877_v8, 0.0  ;;  %v2035_v14 = vsel %vm2031_vm6, %v3111_v46, %v3112_v55 }
0x1461   :  { %v3115_v29 = vpop.permute.xlu1 %3114 }
0x1462   :  { %v3117_v17 = vunpack.i.h.bf16 %v3115_v29  ;;  %v3116_v10 = vunpack.i.l.bf16 %v3115_v29  ;;  %v2150_v29 = vld [vmem:[%s3905_s4 + $0xd0] sm:$0xff] }
0x1464   :  { %1880 = vadd.xlane.f32.xlu0 %v1879_v2  ;;  %v2034_v13 = vsel %vm2031_vm6, %v3117_v17, %v3111_v46 }
0x147a   :  { %3104 = vrot.lane.b32.xlu0 %v3103_v33, %s3228_s15 }
0x147e   :  { %3124 = vrot.lane.b32.xlu0 %v3123_v37, %s3228_s15  ;;  %v2142_v37 = vld [vmem:[%s3905_s4 + $0x90] sm:$0xff] }
0x14ed   :  { %v1884_v43 = vpop.xlane.xlu0 %1883 }
0x14ee   :  { %v1886_v39 = vmul.f32 0.03125, %v1884_v43  ;;  %v2950_v43 = vpack.c.bf16 %v2143_v38, %v2142_v37  ;;  %v3225_v37 = vld [vmem:[%s3904_s3 + $0x30] sm:$0xff]  ;;  %v3226_v38 = vld [vmem:[%s3904_s3 + $0x38] sm:$0xff] }
0x14ef   :  { %v3148_v40 = vpack.i.bf16 %v3226_v38, %v3225_v37 }
0x14f0   :  { %v1888_v41 = vadd.f32 1e-12, %v1886_v39  ;;  %v2126_v39 = vld [vmem:[%s3905_s4 + $0x10] sm:$0xff]  ;;  %2951 = vmatprep.subr.bf16.mxu0 %v2950_v43  ;;  %v29_v43 = vld [vmem:[%s3902_s6 + $0x28] sm:$0xff] }
0x14f1   :  { %v1881_v45 = vpop.xlane.xlu0 %1880 }
0x14f2   :  { %3209 = vrsqrt.f32 %v1888_v41  ;;  %v1885_v47 = vmul.f32 0.03125, %v1881_v45  ;;  %v2127_v41 = vld [vmem:[%s3905_s4 + $0x18] sm:$0xff]  ;;  %v2144_v45 = vld [vmem:[%s3905_s4 + $0xa0] sm:$0xff] }
0x14f4   :  { %v1887_v50 = vadd.f32 1e-12, %v1885_v47  ;;  %v2145_v47 = vld [vmem:[%s3905_s4 + $0xa8] sm:$0xff] }
0x14f5   :  { %v3105_v59 = vpop.permute.xlu0 %3104 }
0x14f6   :  { %3211 = vrsqrt.f32 %v1887_v50  ;;  %v3107_v63 = vunpack.i.h.bf16 %v3105_v59  ;;  %v3106_v6 = vunpack.i.l.bf16 %v3105_v59  ;;  %v2952_v50 = vpack.c.bf16 %v2127_v41, %v2126_v39  ;;  %v2130_v59 = vld [vmem:[%s3905_s4 + $0x30] sm:$0xff] }
0x14f8   :  { %v2033_v0 = vsel %vm2031_vm6, %v3106_v6, %v3107_v63  ;;  %v2032_v12 = vsel %vm2031_vm6, %v3116_v10, %v3106_v6  ;;  %2953 = vmatpush3.bf16.msra.mxu0 %v2952_v50  ;;  %v2148_v63 = vld [vmem:[%s3905_s4 + $0xc0] sm:$0xff]  ;;  %v2149_v6 = vld [vmem:[%s3905_s4 + $0xc8] sm:$0xff] }
0x14f9   :  { %v2938_v31 = vpack.c.bf16 %v2035_v14, %v2033_v0  ;;  %v2940_v53 = vpack.c.bf16 %v2034_v13, %v2032_v12  ;;  %v3125_v11 = vpop.permute.xlu0 %3124  ;;  %v2962_v14 = vpack.c.bf16 %v2149_v6, %v2148_v63  ;;  %v2151_v0 = vld [vmem:[%s3905_s4 + $0xd8] sm:$0xff]  ;;  %v2152_v12 = vld [vmem:[%s3905_s4 + $0xe0] sm:$0xff]  ;;  %v2153_v13 = vld [vmem:[%s3905_s4 + $0xe8] sm:$0xff] }
0x14fa   :  { %v3127_v21 = vunpack.i.h.bf16 %v3125_v11  ;;  %v3126_v30 = vunpack.i.l.bf16 %v3125_v11  ;;  %v2966_v10 = vpack.c.bf16 %v2151_v0, %v2150_v29  ;;  %v2136_v11 = vld [vmem:[%s3905_s4 + $0x60] sm:$0xff] }
0x14fb   :  { %2939 = vmatprep.subr.bf16.mxu1 %v2938_v31  ;;  %v2134_v31 = vld [vmem:[%s3905_s4 + $0x50] sm:$0xff] }
0x14fc   :  { %v3210_v54 = vpop.eup %3209  ;;  %v2039_v23 = vsel %vm2031_vm6, %v3126_v30, %v3127_v21  ;;  %v2137_v21 = vld [vmem:[%s3905_s4 + $0x68] sm:$0xff] }
0x14fd   :  { %v1892_v56 = vmul.f32 %v3210_v54, %v1876_v9  ;;  %v2128_v54 = vld [vmem:[%s3905_s4 + $0x20] sm:$0xff] }
0x14ff   :  { %v1898_v62 = vmul.f32 %v1896_v52, %v1892_v56  ;;  %v2129_v56 = vld [vmem:[%s3905_s4 + $0x28] sm:$0xff] }
0x1500   :  { %v3212_v7 = vpop.eup %3211  ;;  %v2956_v55 = vpack.c.bf16 %v2129_v56, %v2128_v54  ;;  %v1990_v54 = vrot.slane %v3721_v51, %v3413_v16  ;;  %v1994_v56 = vrot.slane %v29_v43, %v3413_v16 }
0x1501   :  { %v1891_v15 = vmul.f32 %v3212_v7, %v3666_v27  ;;  %v1904_v49 = vadd.f32 %v1902_v44, %v1898_v62  ;;  %v3120_v27 = vpop.permute.xlu1 %3119  ;;  %v2131_v62 = vld [vmem:[%s3905_s4 + $0x38] sm:$0xff] }
0x1502   :  { %v3122_v8 = vunpack.i.h.bf16 %v3120_v27  ;;  %v3121_v2 = vunpack.i.l.bf16 %v3120_v27  ;;  %v2960_v7 = vpack.c.bf16 %v2131_v62, %v2130_v59 }
0x1503   :  { %v1897_v1 = vmul.f32 %v1896_v52, %v1891_v15  ;;  %v1911_v9 = vrot.slane %v1904_v49, 7  ;;  %v2954_v52 = vpack.c.bf16 %v2145_v47, %v2144_v45  ;;  %v2132_v15 = vld [vmem:[%s3905_s4 + $0x40] sm:$0xff]  ;;  %v2133_v49 = vld [vmem:[%s3905_s4 + $0x48] sm:$0xff] }
0x1504   :  { %v2037_v60 = vsel %vm2031_vm6, %v3121_v2, %v3122_v8  ;;  %v2964_v17 = vpack.c.bf16 %v2133_v49, %v2132_v15 }
0x1505   :  { %v1903_v4 = vadd.f32 %v1902_v44, %v1897_v1  ;;  %v3130_v5 = vpop.permute.xlu1 %3129  ;;  %v2942_v32 = vpack.c.bf16 %v2039_v23, %v2037_v60  ;;  %v2146_v44 = vld [vmem:[%s3905_s4 + $0xb0] sm:$0xff]  ;;  %2955 = vmatprep.subr.bf16.mxu0 %v2954_v52  ;;  %v2135_v1 = vld [vmem:[%s3905_s4 + $0x58] sm:$0xff] }
0x1506   :  { %v3132_v3 = vunpack.i.h.bf16 %v3130_v5  ;;  %v3131_v25 = vunpack.i.l.bf16 %v3130_v5  ;;  %v2958_v46 = vpack.c.bf16 %v2147_v26, %v2146_v44  ;;  %2957 = vmatpush3.bf16.msra.mxu0 %v2956_v55  ;;  %v2155_v5 = vld [vmem:[%s3905_s4 + $0xf8] sm:$0xff] }
0x1507   :  { %v1913_v58 = vsel %vm1912_vm7, %v1911_v9, %v1903_v4  ;;  %v2968_v4 = vpack.c.bf16 %v2135_v1, %v2134_v31  ;;  %v2970_v9 = vpack.c.bf16 %v2153_v13, %v2152_v12  ;;  %v2139_v60 = vld [vmem:[%s3905_s4 + $0x78] sm:$0xff]  ;;  %v2159_v31 = vrot.slane %v3721_v51, %v3448_v48 }
0x1508   :  { %2784 = vmatmul.mubr.msk.f32.vlgmr.msra.gmra.mrb[16].mxu1 %vm64_vm0, %v1913_v58  ;;  %v2038_v18 = vsel %vm2031_vm6, %v3132_v3, %v3126_v30  ;;  %v2036_v20 = vsel %vm2031_vm6, %v3131_v25, %v3121_v2  ;;  %2959 = vmatprep.subr.bf16.mxu0 %v2958_v46  ;;  %v2972_v30 = vpack.c.bf16 %v2137_v21, %v2136_v11  ;;  %v2138_v25 = vld [vmem:[%s3905_s4 + $0x70] sm:$0xff] }
0x1509   :  { %2941 = vmatpush1.bf16.msra.mxu1 %v2940_v53  ;;  %2115 = vmatprep.mubr.f32.mxu1 %v3236_v61  ;;  %v2944_v33 = vpack.c.bf16 %v2038_v18, %v2036_v20  ;;  %v1908_v53 = vrot.slane %v3721_v51, %v3339_v42  ;;  %v2154_v42 = vld [vmem:[%s3905_s4 + $0xf0] sm:$0xff]  ;;  %v2976_v23 = vpack.c.bf16 %v2139_v60, %v2138_v25  ;;  %v3219_v18 = vld [vmem:[%s3904_s3] sm:$0xff]  ;;  %v3220_v20 = vld [vmem:[%s3904_s3 + $0x8] sm:$0xff] }
0x150a   :  { %2943 = vmatprep.subr.bf16.mxu1 %v2942_v32  ;;  %2961 = vmatpush3.bf16.msra.mxu0 %v2960_v7  ;;  %v2974_v3 = vpack.c.bf16 %v2155_v5, %v2154_v42  ;;  %v3133_v32 = vpack.i.bf16 %v3220_v20, %v3219_v18  ;;  %v2234_v48 = vrot.slane %v3721_v51, %v3451_v57 }
0x150b   :  { %2963 = vmatprep.subr.bf16.mxu0 %v2962_v14 }
0x150c   :  { %3134 = vrot.lane.b32.xlu0 %v3133_v32, %s3231_s21 }
0x150d   :  { %2945 = vmatpush1.bf16.msra.mxu1 %v2944_v33  ;;  %v3221_v33 = vld [vmem:[%s3904_s3 + $0x10] sm:$0xff] }
0x150e   :  { %2978 = vmatprep.subr.bf16.mxu1 %v3234_v22  ;;  %2965 = vmatpush3.bf16.msra.mxu0 %v2964_v17  ;;  %v3138_v28 = vpack.i.bf16 %v3222_v24, %v3221_v33 }
0x150f   :  { %2967 = vmatprep.subr.bf16.mxu0 %v2966_v10 }
0x1510   :  { %3139 = vrot.lane.b32.xlu1 %v3138_v28, %s3231_s21  ;;  %3144 = vrot.lane.b32.xlu0 %v3143_v36, %s3231_s21 }
0x1512   :  { %2969 = vmatpush3.bf16.msra.mxu0 %v2968_v4 }
0x1513   :  { %2971 = vmatprep.subr.bf16.mxu0 %v2970_v9  ;;  %v2333_v9 = vld [vmem:[%s3906_s5] sm:$0xff] }
0x1514   :  { %3149 = vrot.lane.b32.xlu1 %v3148_v40, %s3231_s21 }
0x1516   :  { %2973 = vmatpush3.bf16.msra.mxu0 %v2972_v30 }
0x1517   :  { %2975 = vmatprep.subr.bf16.mxu0 %v2974_v3 }
0x151a   :  { %2977 = vmatpush3.bf16.msra.mxu0 %v2976_v23 }
0x157e   :  { %v3135_v39 = vpop.permute.xlu0 %3134 }
0x157f   :  { %v3137_v45 = vunpack.i.h.bf16 %v3135_v39  ;;  %v3136_v47 = vunpack.i.l.bf16 %v3135_v39 }
0x1581   :  { %v2979_v44 = vpack.c.bf16 %v3137_v45, %v3136_v47 }
0x1582   :  { %v3140_v41 = vpop.permute.xlu1 %3139  ;;  %v3145_v26 = vpop.permute.xlu0 %3144 }
0x1583   :  { %v3142_v50 = vunpack.i.h.bf16 %v3140_v41  ;;  %v3141_v52 = vunpack.i.l.bf16 %v3140_v41  ;;  %v3147_v59 = vunpack.i.h.bf16 %v3145_v26  ;;  %v3146_v62 = vunpack.i.l.bf16 %v3145_v26 }
0x1585   :  { %v2982_v46 = vpack.c.bf16 %v3142_v50, %v3141_v52  ;;  %v2985_v49 = vpack.c.bf16 %v3147_v59, %v3146_v62 }
0x1586   :  { %v3150_v7 = vpop.permute.xlu1 %3149 }
0x1587   :  { %v3152_v29 = vunpack.i.h.bf16 %v3150_v7  ;;  %v3151_v0 = vunpack.i.l.bf16 %v3150_v7 }
0x1589   :  { %v2988_v16 = vpack.c.bf16 %v3152_v29, %v3151_v0 }
0x15db   :  { %v1982_v58 = vpop.f32.mrb[16].mxu1 }
0x15dc   :  { %v1983_v27 = vadd.f32 %v1982_v58, %v1908_v53  ;;  %v2785_v8 = vpop.f32.mrb[17].mxu1 }
0x15de   :  { %3213 = vtanh.f32 %v1983_v27 }
0x15e8   :  { %v3214_v2 = vpop.eup %3213 }
0x15e9   :  { %2472 = vmatmul.mubr.msk.f32.vlgmr.msra.gmra.mrb[18].mxu1 %vm64_vm0, %v3214_v2 }
0x15ea   :  { %2802 = vmatprep.mubr.msk.f32.mxu1 %vm3235_vm5, %v3236_v61  ;;  %2980 = vmatpush3.bf16.msra.mxu1 %v2979_v44 }
0x15eb   :  { %2981 = vmatprep.subr.bf16.mxu1 %v3234_v22 }
0x15ee   :  { %2983 = vmatpush3.bf16.msra.mxu1 %v2982_v46 }
0x15ef   :  { %2984 = vmatprep.subr.bf16.mxu1 %v3234_v22 }
0x15f2   :  { %2986 = vmatpush3.bf16.msra.mxu1 %v2985_v49 }
0x15f3   :  { %2987 = vmatprep.subr.bf16.mxu1 %v3234_v22 }
0x15f6   :  { %2989 = vmatpush3.bf16.msra.mxu1 %v2988_v16 }
0x15f7   :  { %2990 = vmatprep.subr.bf16.mxu1 %v3234_v22  ;;  %v2334_v22 = vld [vmem:[%s3906_s5 + $0x8] sm:$0xff] }
0x15f8   :  { %v2991_v53 = vpack.c.bf16 %v2334_v22, %v2333_v9 }
0x16bc   :  { %v2117_v55 = vpop.f32.mrb[18].mxu1 }
0x16bd   :  { %v2118_v63 = vadd.f32 %v2117_v55, %v1990_v54  ;;  %v2119_v6 = vpop.f32.mrb[19].mxu1 }
0x16be   :  { %v2120_v14 = vadd.f32 %v2119_v6, %v1994_v56 }
0x16bf   :  { %v2122_v17 = vmax.f32 %v2118_v63, 0.0 }
0x16c0   :  { %v2123_v15 = vmax.f32 %v2120_v14, 0.0 }
0x16c2   :  { %2224 = vmatprep.mubr.f32.mxu0 %v2123_v15 }
0x16c3   :  { %2225 = vmatmul.mubr.f32.vlgmr.msra.gmra.mrb[16].mxu0 %v2122_v17 }
0x1796   :  { %v2600_v10 = vpop.f32.mrb[16].mxu0 }
0x1797   :  { %v2601_v1 = vpop.f32.mrb[17].mxu0 }
0x1798   :  { %v2602_v12 = vadd.f32 %v2601_v1, %v2600_v10 }
0x179a   :  { %v2227_v13 = vadd.f32 %v2602_v12, %v2159_v31 }
0x179c   :  { %v2230_v4 = vmax.f32 %v2227_v13, 0.0 }
0x179e   :  { %2803 = vmatmul.mubr.msk.f32.vlgmr.msra.gmra.mrb[20].mxu1 %vm853_vm4, %v2230_v4 }
0x179f   :  { %2809 = vmatprep.mubr.msk.f32.mxu1 %vm3235_vm5, %v3236_v61  ;;  %2992 = vmatpush3.bf16.msra.mxu1 %v2991_v53  ;;  %v2338_v61 = vrot.slane %v3721_v51, %v3508_v19 }
0x1871   :  { %v2328_v58 = vpop.f32.mrb[20].mxu1 }
0x1872   :  { %v2329_v27 = vadd.f32 %v2328_v58, %v2234_v48  ;;  %v2804_v8 = vpop.f32.mrb[21].mxu1 }
0x1874   :  { %v2332_v2 = vmax.f32 %v2329_v27, 0.0 }
0x1876   :  { %2810 = vmatmul.mubr.msk.f32.vlgmr.msra.gmra.mrb[22].mxu1 %vm197_vm1, %v2332_v2 }
0x1949   :  { %v2408_v11 = vpop.f32.mrb[22].mxu1 }
0x194a   :  { %v2409_v21 = vadd.f32 %v2408_v11, %v2338_v61  ;;  %v2811_v30 = vpop.f32.mrb[23].mxu1 }
0x194c   :  { %2426 = vst [vmem:[%s3907_s7 + $0x2] sm:$0x3] %v2409_v21  ;;  %v2413_v42 = vsel %vm2412_vm8, %v2409_v21, -inf }
0x194d   :  { %2414 = vmax.xlane.f32.xlu0 %v2413_v42 }
0x19da   :  { %v2415_v57 = vpop.xlane.xlu0 %2414 }
0x19db   :  { %v2416_v5 = vsub.f32 %v2409_v21, %v2415_v57 }
0x19dd   :  { %v2417_v3 = vmul.f32 1.442695, %v2416_v5 }
0x19df   :  { %3215 = vpow2.f32 %v2417_v3 }
0x19e9   :  { %v3216_v25 = vpop.eup %3215 }
0x19ea   :  { %v2419_v60 = vsel %vm2412_vm8, %v3216_v25, 0.0 }
0x19eb   :  { %2420 = vadd.xlane.f32.xlu1 %v2419_v60 }
0x1a78   :  { %v2421_v23 = vpop.xlane.xlu1 %2420 }
0x1a79   :  { %3217 = vlog2.f32 %v2421_v23 }
0x1a83   :  { %v3218_v19 = vpop.eup %3217 }
0x1a84   :  { %v2423_v51 = vmul.f32 0.6931472, %v3218_v19 }
0x1a86   :  { %v2424_v18 = vsub.f32 %v2416_v5, %v2423_v51 }
0x1a88   :  { %2425 = vst [vmem:[%s3907_s7] sm:$0x3] %v2424_v18 }

</bundles_post_ra>
